<compile_context>
chip_gen: v7x
topology: tpu7x:2x2x1
jax: 0.10.0
libtpu: 0.0.40
codegen_flags: <defaults>
</compile_context>

<pallas_src>
import functools

import jax
import jax.numpy as jnp
from jax.experimental import pallas as pl
from jax.experimental.pallas import tpu as pltpu


def _attention_kernel(x_ref, wq_ref, bq_ref, wk_ref, bk_ref, wv_ref, bv_ref,
                      pb_ref, wo_ref, bo_ref, o_ref, *,
                      nblk, seq, num_head, dim_head):
    """One row block of nblk*(s, e) slabs: QKV proj, per-head attention, out proj."""
    rows = nblk * seq
    e_out = o_ref.shape[-1]

    x = x_ref[...]                                                   # (R, e) bf16

    # Fused QKV projections on the MXU (bf16 inputs, f32 accumulation).
    # The 1/sqrt(d) scale is already folded into wq / bq host-side.
    q = jnp.dot(x, wq_ref[...], preferred_element_type=jnp.float32) + bq_ref[0, :]
    k = jnp.dot(x, wk_ref[...], preferred_element_type=jnp.float32) + bk_ref[0, :]
    v = jnp.dot(x, wv_ref[...], preferred_element_type=jnp.float32) + bv_ref[0, :]

    qb = q.astype(jnp.bfloat16)
    kb = k.astype(jnp.bfloat16)
    vb = v.astype(jnp.bfloat16)

    # Per-head attention, batched over the nblk slabs (single leading batch
    # dim -> the documented batched dot_general form).  Each head's output is
    # accumulated straight into the output projection: no concatenate, no
    # per-head transpose, and no head output stays live past its iteration.
    acc = jnp.zeros((rows, e_out), jnp.float32)
    for hh in range(num_head):
        cs = slice(hh * dim_head, (hh + 1) * dim_head)
        qh = qb[:, cs].reshape(nblk, seq, dim_head)                  # (n, s, d)
        kh = kb[:, cs].reshape(nblk, seq, dim_head)
        vh = vb[:, cs].reshape(nblk, seq, dim_head)

        att = jnp.einsum('bqd,bkd->bqk', qh, kh,
                         preferred_element_type=jnp.float32)         # (n, s, s) f32
        att = att + pb_ref[hh].astype(jnp.float32)[None]             # + pos_bias[h]

        # softmax over last axis (matches torch.nn.Softmax(dim=-1)), kept in f32
        m = jnp.max(att, axis=-1, keepdims=True)
        p = jnp.exp(att - m)
        p = p * pl.reciprocal(jnp.sum(p, axis=-1, keepdims=True), approx=True)
        # TODO(synk): attention dropout would be applied to `p` here (eval: identity).

        zh = jnp.einsum('bqk,bkd->bqd', p.astype(jnp.bfloat16), vh,
                        preferred_element_type=jnp.float32)          # (n, s, d)
        acc = acc + jnp.dot(zh.reshape(rows, dim_head).astype(jnp.bfloat16),
                            wo_ref[cs, :],
                            preferred_element_type=jnp.float32)      # += z_h @ Wo[h]

    o_ref[...] = (acc + bo_ref[0, :]).astype(o_ref.dtype)


def attention_forward(x, params, *, num_head):
    b, w, s, e = x.shape
    d = e // num_head
    hd = num_head * d
    n = b * w
    scale = float(d) ** (-0.5)

    # ---- choose how many (s, e) slabs each grid step processes -------------
    # Target >= ~256 rows per projection matmul (v6e/v7x MXU; >=128 on v5e),
    # but keep the grid length >= 2 so the "parallel" axis can be sharded
    # across v7x's two TensorCores.
    rows_target = 256
    nblk = max(1, min(n, rows_target // max(s, 1)))
    if n >= 2:
        nblk = min(nblk, n // 2)
    nblk = max(nblk, 1)
    while n % nblk != 0:
        nblk -= 1
    # Row block second-minor dim must be a multiple of 8 (sublanes) unless it
    # covers the full array; fall back to one full-extent block otherwise.
    if (nblk * s) % 8 != 0 and nblk != n:
        nblk = n
    rows = nblk * s

    # ---- param prep: fold the scale into Wq/bq, cast MXU operands to bf16 --
    wq = (params["wq"] * scale).astype(jnp.bfloat16)
    bq = (params["bq"] * scale).astype(jnp.float32)
    wk = params["wk"].astype(jnp.bfloat16)
    bk = params["bk"].astype(jnp.float32)
    wv = params["wv"].astype(jnp.bfloat16)
    bv = params["bv"].astype(jnp.float32)
    wo = params["wo"].astype(jnp.bfloat16)
    bo = params["bo"].astype(jnp.float32)
    pb = params["pos_bias"].astype(jnp.bfloat16)

    xf = x.reshape(n * s, e).astype(jnp.bfloat16)

    kernel = functools.partial(_attention_kernel, nblk=nblk, seq=s,
                               num_head=num_head, dim_head=d)

    const2d = lambda shp: pl.BlockSpec(shp, lambda i: (0, 0))   # grid-invariant

    out = pl.pallas_call(
        kernel,
        out_shape=jax.ShapeDtypeStruct((n * s, e), x.dtype),
        grid=(n // nblk,),
        in_specs=[
            pl.BlockSpec((rows, e), lambda i: (i, 0)),             # x row block
            const2d((e, hd)), const2d((1, hd)),                    # Wq, bq
            const2d((e, hd)), const2d((1, hd)),                    # Wk, bk
            const2d((e, hd)), const2d((1, hd)),                    # Wv, bv
            pl.BlockSpec((num_head, s, s), lambda i: (0, 0, 0)),   # pos_bias
            const2d((hd, e)), const2d((1, e)),                     # Wo, bo
        ],
        out_specs=pl.BlockSpec((rows, e), lambda i: (i, 0)),
        compiler_params=pltpu.CompilerParams(
            dimension_semantics=("parallel",)),
    )(xf, wq, bq, wk, bk, wv, bv, pb, wo, bo)

    return out.reshape(b, w, s, e)


def attention_reference(x, params, *, num_head):
    """Pure-JAX f32 mirror of the PyTorch forward (eval mode) for validation."""
    b, w, s, e = x.shape
    d = e // num_head
    h = num_head
    scale = float(d) ** (-0.5)

    q = x @ params["wq"] + params["bq"][0]
    k = x @ params["wk"] + params["bk"][0]
    v = x @ params["wv"] + params["bv"][0]
    q = scale * q
    q = q.reshape(b, w, s, h, d).transpose(0, 1, 3, 2, 4)
    k = k.reshape(b, w, s, h, d).transpose(0, 1, 3, 2, 4)
    v = v.reshape(b, w, s, h, d).transpose(0, 1, 3, 2, 4)
    att = jnp.einsum("bwhqd,bwhkd->bwhqk", q, k) + params["pos_bias"]
    att = jax.nn.softmax(att, axis=-1)
    z = jnp.einsum("bwhqk,bwhkd->bwhqd", att, v)
    z = z.transpose(0, 1, 3, 2, 4).reshape(b, w, s, h * d)
    return z @ params["wo"] + params["bo"][0]


def init_params(key, dim_embedding, num_head, seq):
    d = dim_embedding // num_head
    hd = num_head * d
    ks = jax.random.split(key, 9)
    std = 0.05
    return {
        "wq": std * jax.random.normal(ks[0], (dim_embedding, hd), jnp.float32),
        "bq": std * jax.random.normal(ks[1], (1, hd), jnp.float32),
        "wk": std * jax.random.normal(ks[2], (dim_embedding, hd), jnp.float32),
        "bk": std * jax.random.normal(ks[3], (1, hd), jnp.float32),
        "wv": std * jax.random.normal(ks[4], (dim_embedding, hd), jnp.float32),
        "bv": std * jax.random.normal(ks[5], (1, hd), jnp.float32),
        "pos_bias": std * jax.random.normal(ks[6], (num_head, seq, seq), jnp.float32),
        "wo": std * jax.random.normal(ks[7], (hd, dim_embedding), jnp.float32),
        "bo": std * jax.random.normal(ks[8], (1, dim_embedding), jnp.float32),
    }


if __name__ == "__main__":
    b, w, s, e = 2, 2, 8, 32
    num_head = 4

    key = jax.random.PRNGKey(0)
    kx, kp = jax.random.split(key)
    x = jax.random.normal(kx, (b, w, s, e), jnp.float32)
    params = init_params(kp, e, num_head, s)

    out = attention_forward(x, params, num_head=num_head)
    out = jax.block_until_ready(out)

    ref = attention_reference(x, params, num_head=num_head)
    assert out.shape == (b, w, s, e)
    # bf16 MXU operands + approx reciprocal -> compare at loose-but-tight-enough tol
    assert jnp.allclose(out, ref, rtol=2e-2, atol=2e-2), "mismatch vs reference"

    print("KERNEL_OK")
</pallas_src>

<mosaic_0001>
module attributes {stable_mosaic.version = 11 : i64} {
  func.func @_attention_kernel(%arg0: i32, %arg1: memref<16x32xbf16, #tpu.memory_space<vmem>>, %arg2: memref<32x32xbf16, #tpu.memory_space<vmem>>, %arg3: memref<1x32xf32, #tpu.memory_space<vmem>>, %arg4: memref<32x32xbf16, #tpu.memory_space<vmem>>, %arg5: memref<1x32xf32, #tpu.memory_space<vmem>>, %arg6: memref<32x32xbf16, #tpu.memory_space<vmem>>, %arg7: memref<1x32xf32, #tpu.memory_space<vmem>>, %arg8: memref<4x8x8xbf16, #tpu.memory_space<vmem>>, %arg9: memref<32x32xbf16, #tpu.memory_space<vmem>>, %arg10: memref<1x32xf32, #tpu.memory_space<vmem>>, %arg11: memref<16x32xf32, #tpu.memory_space<vmem>>) attributes {dimension_semantics = [#tpu.dimension_semantics<parallel>], iteration_bounds = array<i64: 2>, scalar_prefetch = 0 : i64, scratch_operands = 0 : i64, tpu.core_type = #tpu.core_type<tc>, window_params = [{transform_indices = @transform_0, window_bounds = array<i64: 16, 32>}, {pipeline_mode = #tpu.pipeline_mode<synchronous>, transform_indices = @transform_1, window_bounds = array<i64: 32, 32>}, {pipeline_mode = #tpu.pipeline_mode<synchronous>, transform_indices = @transform_2, window_bounds = array<i64: 1, 32>}, {pipeline_mode = #tpu.pipeline_mode<synchronous>, transform_indices = @transform_3, window_bounds = array<i64: 32, 32>}, {pipeline_mode = #tpu.pipeline_mode<synchronous>, transform_indices = @transform_4, window_bounds = array<i64: 1, 32>}, {pipeline_mode = #tpu.pipeline_mode<synchronous>, transform_indices = @transform_5, window_bounds = array<i64: 32, 32>}, {pipeline_mode = #tpu.pipeline_mode<synchronous>, transform_indices = @transform_6, window_bounds = array<i64: 1, 32>}, {pipeline_mode = #tpu.pipeline_mode<synchronous>, transform_indices = @transform_7, window_bounds = array<i64: 4, 8, 8>}, {pipeline_mode = #tpu.pipeline_mode<synchronous>, transform_indices = @transform_8, window_bounds = array<i64: 32, 32>}, {pipeline_mode = #tpu.pipeline_mode<synchronous>, transform_indices = @transform_9, window_bounds = array<i64: 1, 32>}, {transform_indices = @transform_10, window_bounds = array<i64: 16, 32>}]} {
    %c0 = arith.constant 0 : index
    %c0_0 = arith.constant 0 : index
    %0 = vector.load %arg1[%c0, %c0_0] : memref<16x32xbf16, #tpu.memory_space<vmem>>, vector<16x32xbf16>
    %c0_1 = arith.constant 0 : index
    %c0_2 = arith.constant 0 : index
    %1 = vector.load %arg2[%c0_1, %c0_2] : memref<32x32xbf16, #tpu.memory_space<vmem>>, vector<32x32xbf16>
    %cst = arith.constant dense<0.000000e+00> : vector<16x32xf32>
    %2 = tpu.matmul %0, %1, %cst {dimension_numbers = #tpu.dot_dimension_numbers<[1], [0], [0], [1], [0, 0, 1, 1], [], []>} : vector<16x32xbf16>, vector<32x32xbf16>, vector<16x32xf32> -> vector<16x32xf32>
    %c0_3 = arith.constant 0 : index
    %c0_4 = arith.constant 0 : index
    %3 = vector.load %arg3[%c0_3, %c0_4] : memref<1x32xf32, #tpu.memory_space<vmem>>, vector<1x32xf32>
    %4 = vector.shape_cast %3 : vector<1x32xf32> to vector<32xf32>
    %5 = vector.shape_cast %4 : vector<32xf32> to vector<1x32xf32>
    %6 = vector.broadcast %5 : vector<1x32xf32> to vector<16x32xf32>
    %7 = arith.addf %2, %6 : vector<16x32xf32>
    %c0_5 = arith.constant 0 : index
    %c0_6 = arith.constant 0 : index
    %8 = vector.load %arg4[%c0_5, %c0_6] : memref<32x32xbf16, #tpu.memory_space<vmem>>, vector<32x32xbf16>
    %cst_7 = arith.constant dense<0.000000e+00> : vector<16x32xf32>
    %9 = tpu.matmul %0, %8, %cst_7 {dimension_numbers = #tpu.dot_dimension_numbers<[1], [0], [0], [1], [0, 0, 1, 1], [], []>} : vector<16x32xbf16>, vector<32x32xbf16>, vector<16x32xf32> -> vector<16x32xf32>
    %c0_8 = arith.constant 0 : index
    %c0_9 = arith.constant 0 : index
    %10 = vector.load %arg5[%c0_8, %c0_9] : memref<1x32xf32, #tpu.memory_space<vmem>>, vector<1x32xf32>
    %11 = vector.shape_cast %10 : vector<1x32xf32> to vector<32xf32>
    %12 = vector.shape_cast %11 : vector<32xf32> to vector<1x32xf32>
    %13 = vector.broadcast %12 : vector<1x32xf32> to vector<16x32xf32>
    %14 = arith.addf %9, %13 : vector<16x32xf32>
    %c0_10 = arith.constant 0 : index
    %c0_11 = arith.constant 0 : index
    %15 = vector.load %arg6[%c0_10, %c0_11] : memref<32x32xbf16, #tpu.memory_space<vmem>>, vector<32x32xbf16>
    %cst_12 = arith.constant dense<0.000000e+00> : vector<16x32xf32>
    %16 = tpu.matmul %0, %15, %cst_12 {dimension_numbers = #tpu.dot_dimension_numbers<[1], [0], [0], [1], [0, 0, 1, 1], [], []>} : vector<16x32xbf16>, vector<32x32xbf16>, vector<16x32xf32> -> vector<16x32xf32>
    %c0_13 = arith.constant 0 : index
    %c0_14 = arith.constant 0 : index
    %17 = vector.load %arg7[%c0_13, %c0_14] : memref<1x32xf32, #tpu.memory_space<vmem>>, vector<1x32xf32>
    %18 = vector.shape_cast %17 : vector<1x32xf32> to vector<32xf32>
    %19 = vector.shape_cast %18 : vector<32xf32> to vector<1x32xf32>
    %20 = vector.broadcast %19 : vector<1x32xf32> to vector<16x32xf32>
    %21 = arith.addf %16, %20 : vector<16x32xf32>
    %22 = arith.truncf %7 : vector<16x32xf32> to vector<16x32xbf16>
    %23 = arith.truncf %14 : vector<16x32xf32> to vector<16x32xbf16>
    %24 = arith.truncf %21 : vector<16x32xf32> to vector<16x32xbf16>
    %cst_15 = arith.constant 0.000000e+00 : f32
    %25 = vector.broadcast %cst_15 : f32 to vector<16x32xf32>
    %26 = vector.extract_strided_slice %22 {offsets = [0, 0], sizes = [16, 8], strides = [1, 1]} : vector<16x32xbf16> to vector<16x8xbf16>
    %27 = vector.shape_cast %26 : vector<16x8xbf16> to vector<2x8x8xbf16>
    %28 = vector.extract_strided_slice %23 {offsets = [0, 0], sizes = [16, 8], strides = [1, 1]} : vector<16x32xbf16> to vector<16x8xbf16>
    %29 = vector.shape_cast %28 : vector<16x8xbf16> to vector<2x8x8xbf16>
    %30 = vector.extract_strided_slice %24 {offsets = [0, 0], sizes = [16, 8], strides = [1, 1]} : vector<16x32xbf16> to vector<16x8xbf16>
    %31 = vector.shape_cast %30 : vector<16x8xbf16> to vector<2x8x8xbf16>
    "tpu.trace_start"() <{level = 10 : i32, message = "bqd,bkd->bqk"}> : () -> ()
    %cst_16 = arith.constant dense<0.000000e+00> : vector<2x8x8xf32>
    %32 = tpu.matmul %27, %29, %cst_16 {dimension_numbers = #tpu.dot_dimension_numbers<[2], [2], [1], [1], [0, 0, 0, 1, 1, 1], [0], [0]>} : vector<2x8x8xbf16>, vector<2x8x8xbf16>, vector<2x8x8xf32> -> vector<2x8x8xf32>
    "tpu.trace_stop"() : () -> ()
    %c0_17 = arith.constant 0 : index
    %c0_18 = arith.constant 0 : index
    %c0_19 = arith.constant 0 : index
    %33 = vector.load %arg8[%c0_17, %c0_18, %c0_19] : memref<4x8x8xbf16, #tpu.memory_space<vmem>>, vector<1x8x8xbf16>
    %34 = vector.shape_cast %33 : vector<1x8x8xbf16> to vector<8x8xbf16>
    %35 = arith.extf %34 : vector<8x8xbf16> to vector<8x8xf32>
    %36 = vector.shape_cast %35 : vector<8x8xf32> to vector<1x8x8xf32>
    %37 = vector.broadcast %36 : vector<1x8x8xf32> to vector<2x8x8xf32>
    %38 = arith.addf %32, %37 : vector<2x8x8xf32>
    %cst_20 = arith.constant dense<0xFF800000> : vector<2x8xf32>
    %39 = vector.multi_reduction <maximumf>, %38, %cst_20 [2] : vector<2x8x8xf32> to vector<2x8xf32>
    %40 = vector.shape_cast %39 : vector<2x8xf32> to vector<2x8x1xf32>
    %41 = vector.broadcast %40 : vector<2x8x1xf32> to vector<2x8x8xf32>
    %42 = arith.subf %38, %41 : vector<2x8x8xf32>
    %43 = math.exp %42 : vector<2x8x8xf32>
    %cst_21 = arith.constant dense<0.000000e+00> : vector<2x8xf32>
    %44 = vector.multi_reduction <add>, %43, %cst_21 [2] : vector<2x8x8xf32> to vector<2x8xf32>
    %45 = vector.shape_cast %44 : vector<2x8xf32> to vector<2x8x1xf32>
    %46 = tpu.reciprocal %45 {approx = true} : vector<2x8x1xf32> -> vector<2x8x1xf32>
    %47 = vector.broadcast %46 : vector<2x8x1xf32> to vector<2x8x8xf32>
    %48 = arith.mulf %43, %47 : vector<2x8x8xf32>
    %49 = arith.truncf %48 : vector<2x8x8xf32> to vector<2x8x8xbf16>
    "tpu.trace_start"() <{level = 10 : i32, message = "bqk,bkd->bqd"}> : () -> ()
    %cst_22 = arith.constant dense<0.000000e+00> : vector<2x8x8xf32>
    %50 = tpu.matmul %49, %31, %cst_22 {dimension_numbers = #tpu.dot_dimension_numbers<[2], [1], [1], [2], [0, 0, 0, 1, 1, 2], [0], [0]>} : vector<2x8x8xbf16>, vector<2x8x8xbf16>, vector<2x8x8xf32> -> vector<2x8x8xf32>
    "tpu.trace_stop"() : () -> ()
    %51 = vector.shape_cast %50 : vector<2x8x8xf32> to vector<16x8xf32>
    %52 = arith.truncf %51 : vector<16x8xf32> to vector<16x8xbf16>
    %c0_23 = arith.constant 0 : index
    %c0_24 = arith.constant 0 : index
    %53 = vector.load %arg9[%c0_23, %c0_24] : memref<32x32xbf16, #tpu.memory_space<vmem>>, vector<8x32xbf16>
    %cst_25 = arith.constant dense<0.000000e+00> : vector<16x32xf32>
    %54 = tpu.matmul %52, %53, %cst_25 {dimension_numbers = #tpu.dot_dimension_numbers<[1], [0], [0], [1], [0, 0, 1, 1], [], []>} : vector<16x8xbf16>, vector<8x32xbf16>, vector<16x32xf32> -> vector<16x32xf32>
    %55 = arith.addf %25, %54 : vector<16x32xf32>
    %56 = vector.extract_strided_slice %22 {offsets = [0, 8], sizes = [16, 8], strides = [1, 1]} : vector<16x32xbf16> to vector<16x8xbf16>
    %57 = vector.shape_cast %56 : vector<16x8xbf16> to vector<2x8x8xbf16>
    %58 = vector.extract_strided_slice %23 {offsets = [0, 8], sizes = [16, 8], strides = [1, 1]} : vector<16x32xbf16> to vector<16x8xbf16>
    %59 = vector.shape_cast %58 : vector<16x8xbf16> to vector<2x8x8xbf16>
    %60 = vector.extract_strided_slice %24 {offsets = [0, 8], sizes = [16, 8], strides = [1, 1]} : vector<16x32xbf16> to vector<16x8xbf16>
    %61 = vector.shape_cast %60 : vector<16x8xbf16> to vector<2x8x8xbf16>
    "tpu.trace_start"() <{level = 10 : i32, message = "bqd,bkd->bqk"}> : () -> ()
    %cst_26 = arith.constant dense<0.000000e+00> : vector<2x8x8xf32>
    %62 = tpu.matmul %57, %59, %cst_26 {dimension_numbers = #tpu.dot_dimension_numbers<[2], [2], [1], [1], [0, 0, 0, 1, 1, 1], [0], [0]>} : vector<2x8x8xbf16>, vector<2x8x8xbf16>, vector<2x8x8xf32> -> vector<2x8x8xf32>
    "tpu.trace_stop"() : () -> ()
    %c1 = arith.constant 1 : index
    %c0_27 = arith.constant 0 : index
    %c0_28 = arith.constant 0 : index
    %63 = vector.load %arg8[%c1, %c0_27, %c0_28] : memref<4x8x8xbf16, #tpu.memory_space<vmem>>, vector<1x8x8xbf16>
    %64 = vector.shape_cast %63 : vector<1x8x8xbf16> to vector<8x8xbf16>
    %65 = arith.extf %64 : vector<8x8xbf16> to vector<8x8xf32>
    %66 = vector.shape_cast %65 : vector<8x8xf32> to vector<1x8x8xf32>
    %67 = vector.broadcast %66 : vector<1x8x8xf32> to vector<2x8x8xf32>
    %68 = arith.addf %62, %67 : vector<2x8x8xf32>
    %cst_29 = arith.constant dense<0xFF800000> : vector<2x8xf32>
    %69 = vector.multi_reduction <maximumf>, %68, %cst_29 [2] : vector<2x8x8xf32> to vector<2x8xf32>
    %70 = vector.shape_cast %69 : vector<2x8xf32> to vector<2x8x1xf32>
    %71 = vector.broadcast %70 : vector<2x8x1xf32> to vector<2x8x8xf32>
    %72 = arith.subf %68, %71 : vector<2x8x8xf32>
    %73 = math.exp %72 : vector<2x8x8xf32>
    %cst_30 = arith.constant dense<0.000000e+00> : vector<2x8xf32>
    %74 = vector.multi_reduction <add>, %73, %cst_30 [2] : vector<2x8x8xf32> to vector<2x8xf32>
    %75 = vector.shape_cast %74 : vector<2x8xf32> to vector<2x8x1xf32>
    %76 = tpu.reciprocal %75 {approx = true} : vector<2x8x1xf32> -> vector<2x8x1xf32>
    %77 = vector.broadcast %76 : vector<2x8x1xf32> to vector<2x8x8xf32>
    %78 = arith.mulf %73, %77 : vector<2x8x8xf32>
    %79 = arith.truncf %78 : vector<2x8x8xf32> to vector<2x8x8xbf16>
    "tpu.trace_start"() <{level = 10 : i32, message = "bqk,bkd->bqd"}> : () -> ()
    %cst_31 = arith.constant dense<0.000000e+00> : vector<2x8x8xf32>
    %80 = tpu.matmul %79, %61, %cst_31 {dimension_numbers = #tpu.dot_dimension_numbers<[2], [1], [1], [2], [0, 0, 0, 1, 1, 2], [0], [0]>} : vector<2x8x8xbf16>, vector<2x8x8xbf16>, vector<2x8x8xf32> -> vector<2x8x8xf32>
    "tpu.trace_stop"() : () -> ()
    %81 = vector.shape_cast %80 : vector<2x8x8xf32> to vector<16x8xf32>
    %82 = arith.truncf %81 : vector<16x8xf32> to vector<16x8xbf16>
    %c8 = arith.constant 8 : index
    %c0_32 = arith.constant 0 : index
    %83 = vector.load %arg9[%c8, %c0_32] : memref<32x32xbf16, #tpu.memory_space<vmem>>, vector<8x32xbf16>
    %cst_33 = arith.constant dense<0.000000e+00> : vector<16x32xf32>
    %84 = tpu.matmul %82, %83, %cst_33 {dimension_numbers = #tpu.dot_dimension_numbers<[1], [0], [0], [1], [0, 0, 1, 1], [], []>} : vector<16x8xbf16>, vector<8x32xbf16>, vector<16x32xf32> -> vector<16x32xf32>
    %85 = arith.addf %55, %84 : vector<16x32xf32>
    %86 = vector.extract_strided_slice %22 {offsets = [0, 16], sizes = [16, 8], strides = [1, 1]} : vector<16x32xbf16> to vector<16x8xbf16>
    %87 = vector.shape_cast %86 : vector<16x8xbf16> to vector<2x8x8xbf16>
    %88 = vector.extract_strided_slice %23 {offsets = [0, 16], sizes = [16, 8], strides = [1, 1]} : vector<16x32xbf16> to vector<16x8xbf16>
    %89 = vector.shape_cast %88 : vector<16x8xbf16> to vector<2x8x8xbf16>
    %90 = vector.extract_strided_slice %24 {offsets = [0, 16], sizes = [16, 8], strides = [1, 1]} : vector<16x32xbf16> to vector<16x8xbf16>
    %91 = vector.shape_cast %90 : vector<16x8xbf16> to vector<2x8x8xbf16>
    "tpu.trace_start"() <{level = 10 : i32, message = "bqd,bkd->bqk"}> : () -> ()
    %cst_34 = arith.constant dense<0.000000e+00> : vector<2x8x8xf32>
    %92 = tpu.matmul %87, %89, %cst_34 {dimension_numbers = #tpu.dot_dimension_numbers<[2], [2], [1], [1], [0, 0, 0, 1, 1, 1], [0], [0]>} : vector<2x8x8xbf16>, vector<2x8x8xbf16>, vector<2x8x8xf32> -> vector<2x8x8xf32>
    "tpu.trace_stop"() : () -> ()
    %c2 = arith.constant 2 : index
    %c0_35 = arith.constant 0 : index
    %c0_36 = arith.constant 0 : index
    %93 = vector.load %arg8[%c2, %c0_35, %c0_36] : memref<4x8x8xbf16, #tpu.memory_space<vmem>>, vector<1x8x8xbf16>
    %94 = vector.shape_cast %93 : vector<1x8x8xbf16> to vector<8x8xbf16>
    %95 = arith.extf %94 : vector<8x8xbf16> to vector<8x8xf32>
    %96 = vector.shape_cast %95 : vector<8x8xf32> to vector<1x8x8xf32>
    %97 = vector.broadcast %96 : vector<1x8x8xf32> to vector<2x8x8xf32>
    %98 = arith.addf %92, %97 : vector<2x8x8xf32>
    %cst_37 = arith.constant dense<0xFF800000> : vector<2x8xf32>
    %99 = vector.multi_reduction <maximumf>, %98, %cst_37 [2] : vector<2x8x8xf32> to vector<2x8xf32>
    %100 = vector.shape_cast %99 : vector<2x8xf32> to vector<2x8x1xf32>
    %101 = vector.broadcast %100 : vector<2x8x1xf32> to vector<2x8x8xf32>
    %102 = arith.subf %98, %101 : vector<2x8x8xf32>
    %103 = math.exp %102 : vector<2x8x8xf32>
    %cst_38 = arith.constant dense<0.000000e+00> : vector<2x8xf32>
    %104 = vector.multi_reduction <add>, %103, %cst_38 [2] : vector<2x8x8xf32> to vector<2x8xf32>
    %105 = vector.shape_cast %104 : vector<2x8xf32> to vector<2x8x1xf32>
    %106 = tpu.reciprocal %105 {approx = true} : vector<2x8x1xf32> -> vector<2x8x1xf32>
    %107 = vector.broadcast %106 : vector<2x8x1xf32> to vector<2x8x8xf32>
    %108 = arith.mulf %103, %107 : vector<2x8x8xf32>
    %109 = arith.truncf %108 : vector<2x8x8xf32> to vector<2x8x8xbf16>
    "tpu.trace_start"() <{level = 10 : i32, message = "bqk,bkd->bqd"}> : () -> ()
    %cst_39 = arith.constant dense<0.000000e+00> : vector<2x8x8xf32>
    %110 = tpu.matmul %109, %91, %cst_39 {dimension_numbers = #tpu.dot_dimension_numbers<[2], [1], [1], [2], [0, 0, 0, 1, 1, 2], [0], [0]>} : vector<2x8x8xbf16>, vector<2x8x8xbf16>, vector<2x8x8xf32> -> vector<2x8x8xf32>
    "tpu.trace_stop"() : () -> ()
    %111 = vector.shape_cast %110 : vector<2x8x8xf32> to vector<16x8xf32>
    %112 = arith.truncf %111 : vector<16x8xf32> to vector<16x8xbf16>
    %c16 = arith.constant 16 : index
    %c0_40 = arith.constant 0 : index
    %113 = vector.load %arg9[%c16, %c0_40] : memref<32x32xbf16, #tpu.memory_space<vmem>>, vector<8x32xbf16>
    %cst_41 = arith.constant dense<0.000000e+00> : vector<16x32xf32>
    %114 = tpu.matmul %112, %113, %cst_41 {dimension_numbers = #tpu.dot_dimension_numbers<[1], [0], [0], [1], [0, 0, 1, 1], [], []>} : vector<16x8xbf16>, vector<8x32xbf16>, vector<16x32xf32> -> vector<16x32xf32>
    %115 = arith.addf %85, %114 : vector<16x32xf32>
    %116 = vector.extract_strided_slice %22 {offsets = [0, 24], sizes = [16, 8], strides = [1, 1]} : vector<16x32xbf16> to vector<16x8xbf16>
    %117 = vector.shape_cast %116 : vector<16x8xbf16> to vector<2x8x8xbf16>
    %118 = vector.extract_strided_slice %23 {offsets = [0, 24], sizes = [16, 8], strides = [1, 1]} : vector<16x32xbf16> to vector<16x8xbf16>
    %119 = vector.shape_cast %118 : vector<16x8xbf16> to vector<2x8x8xbf16>
    %120 = vector.extract_strided_slice %24 {offsets = [0, 24], sizes = [16, 8], strides = [1, 1]} : vector<16x32xbf16> to vector<16x8xbf16>
    %121 = vector.shape_cast %120 : vector<16x8xbf16> to vector<2x8x8xbf16>
    "tpu.trace_start"() <{level = 10 : i32, message = "bqd,bkd->bqk"}> : () -> ()
    %cst_42 = arith.constant dense<0.000000e+00> : vector<2x8x8xf32>
    %122 = tpu.matmul %117, %119, %cst_42 {dimension_numbers = #tpu.dot_dimension_numbers<[2], [2], [1], [1], [0, 0, 0, 1, 1, 1], [0], [0]>} : vector<2x8x8xbf16>, vector<2x8x8xbf16>, vector<2x8x8xf32> -> vector<2x8x8xf32>
    "tpu.trace_stop"() : () -> ()
    %c3 = arith.constant 3 : index
    %c0_43 = arith.constant 0 : index
    %c0_44 = arith.constant 0 : index
    %123 = vector.load %arg8[%c3, %c0_43, %c0_44] : memref<4x8x8xbf16, #tpu.memory_space<vmem>>, vector<1x8x8xbf16>
    %124 = vector.shape_cast %123 : vector<1x8x8xbf16> to vector<8x8xbf16>
    %125 = arith.extf %124 : vector<8x8xbf16> to vector<8x8xf32>
    %126 = vector.shape_cast %125 : vector<8x8xf32> to vector<1x8x8xf32>
    %127 = vector.broadcast %126 : vector<1x8x8xf32> to vector<2x8x8xf32>
    %128 = arith.addf %122, %127 : vector<2x8x8xf32>
    %cst_45 = arith.constant dense<0xFF800000> : vector<2x8xf32>
    %129 = vector.multi_reduction <maximumf>, %128, %cst_45 [2] : vector<2x8x8xf32> to vector<2x8xf32>
    %130 = vector.shape_cast %129 : vector<2x8xf32> to vector<2x8x1xf32>
    %131 = vector.broadcast %130 : vector<2x8x1xf32> to vector<2x8x8xf32>
    %132 = arith.subf %128, %131 : vector<2x8x8xf32>
    %133 = math.exp %132 : vector<2x8x8xf32>
    %cst_46 = arith.constant dense<0.000000e+00> : vector<2x8xf32>
    %134 = vector.multi_reduction <add>, %133, %cst_46 [2] : vector<2x8x8xf32> to vector<2x8xf32>
    %135 = vector.shape_cast %134 : vector<2x8xf32> to vector<2x8x1xf32>
    %136 = tpu.reciprocal %135 {approx = true} : vector<2x8x1xf32> -> vector<2x8x1xf32>
    %137 = vector.broadcast %136 : vector<2x8x1xf32> to vector<2x8x8xf32>
    %138 = arith.mulf %133, %137 : vector<2x8x8xf32>
    %139 = arith.truncf %138 : vector<2x8x8xf32> to vector<2x8x8xbf16>
    "tpu.trace_start"() <{level = 10 : i32, message = "bqk,bkd->bqd"}> : () -> ()
    %cst_47 = arith.constant dense<0.000000e+00> : vector<2x8x8xf32>
    %140 = tpu.matmul %139, %121, %cst_47 {dimension_numbers = #tpu.dot_dimension_numbers<[2], [1], [1], [2], [0, 0, 0, 1, 1, 2], [0], [0]>} : vector<2x8x8xbf16>, vector<2x8x8xbf16>, vector<2x8x8xf32> -> vector<2x8x8xf32>
    "tpu.trace_stop"() : () -> ()
    %141 = vector.shape_cast %140 : vector<2x8x8xf32> to vector<16x8xf32>
    %142 = arith.truncf %141 : vector<16x8xf32> to vector<16x8xbf16>
    %c24 = arith.constant 24 : index
    %c0_48 = arith.constant 0 : index
    %143 = vector.load %arg9[%c24, %c0_48] : memref<32x32xbf16, #tpu.memory_space<vmem>>, vector<8x32xbf16>
    %cst_49 = arith.constant dense<0.000000e+00> : vector<16x32xf32>
    %144 = tpu.matmul %142, %143, %cst_49 {dimension_numbers = #tpu.dot_dimension_numbers<[1], [0], [0], [1], [0, 0, 1, 1], [], []>} : vector<16x8xbf16>, vector<8x32xbf16>, vector<16x32xf32> -> vector<16x32xf32>
    %145 = arith.addf %115, %144 : vector<16x32xf32>
    %c0_50 = arith.constant 0 : index
    %c0_51 = arith.constant 0 : index
    %146 = vector.load %arg10[%c0_50, %c0_51] : memref<1x32xf32, #tpu.memory_space<vmem>>, vector<1x32xf32>
    %147 = vector.shape_cast %146 : vector<1x32xf32> to vector<32xf32>
    %148 = vector.shape_cast %147 : vector<32xf32> to vector<1x32xf32>
    %149 = vector.broadcast %148 : vector<1x32xf32> to vector<16x32xf32>
    %150 = arith.addf %145, %149 : vector<16x32xf32>
    %c0_52 = arith.constant 0 : index
    %c0_53 = arith.constant 0 : index
    %151 = vector.load %arg11[%c0_52, %c0_53] : memref<16x32xf32, #tpu.memory_space<vmem>>, vector<16x32xf32>
    tpu.vector_store %arg11[%c0_52, %c0_53], %150 {strides = array<i32>} : memref<16x32xf32, #tpu.memory_space<vmem>>, vector<16x32xf32>,
    return
  }
  func.func @transform_0(%arg0: i32) -> (i32, i32) {
    %c0_i32 = arith.constant 0 : i32
    %c0_i32_0 = arith.constant 0 : i32
    return %arg0, %c0_i32 : i32, i32
  }
  func.func @transform_1(%arg0: i32) -> (i32, i32) {
    %c0_i32 = arith.constant 0 : i32
    %c0_i32_0 = arith.constant 0 : i32
    %c0_i32_1 = arith.constant 0 : i32
    return %c0_i32, %c0_i32_0 : i32, i32
  }
  func.func @transform_2(%arg0: i32) -> (i32, i32) {
    %c0_i32 = arith.constant 0 : i32
    %c0_i32_0 = arith.constant 0 : i32
    %c0_i32_1 = arith.constant 0 : i32
    return %c0_i32, %c0_i32_0 : i32, i32
  }
  func.func @transform_3(%arg0: i32) -> (i32, i32) {
    %c0_i32 = arith.constant 0 : i32
    %c0_i32_0 = arith.constant 0 : i32
    %c0_i32_1 = arith.constant 0 : i32
    return %c0_i32, %c0_i32_0 : i32, i32
  }
  func.func @transform_4(%arg0: i32) -> (i32, i32) {
    %c0_i32 = arith.constant 0 : i32
    %c0_i32_0 = arith.constant 0 : i32
    %c0_i32_1 = arith.constant 0 : i32
    return %c0_i32, %c0_i32_0 : i32, i32
  }
  func.func @transform_5(%arg0: i32) -> (i32, i32) {
    %c0_i32 = arith.constant 0 : i32
    %c0_i32_0 = arith.constant 0 : i32
    %c0_i32_1 = arith.constant 0 : i32
    return %c0_i32, %c0_i32_0 : i32, i32
  }
  func.func @transform_6(%arg0: i32) -> (i32, i32) {
    %c0_i32 = arith.constant 0 : i32
    %c0_i32_0 = arith.constant 0 : i32
    %c0_i32_1 = arith.constant 0 : i32
    return %c0_i32, %c0_i32_0 : i32, i32
  }
  func.func @transform_7(%arg0: i32) -> (i32, i32, i32) {
    %c0_i32 = arith.constant 0 : i32
    %c0_i32_0 = arith.constant 0 : i32
    %c0_i32_1 = arith.constant 0 : i32
    %c0_i32_2 = arith.constant 0 : i32
    return %c0_i32, %c0_i32_0, %c0_i32_1 : i32, i32, i32
  }
  func.func @transform_8(%arg0: i32) -> (i32, i32) {
    %c0_i32 = arith.constant 0 : i32
    %c0_i32_0 = arith.constant 0 : i32
    %c0_i32_1 = arith.constant 0 : i32
    return %c0_i32, %c0_i32_0 : i32, i32
  }
  func.func @transform_9(%arg0: i32) -> (i32, i32) {
    %c0_i32 = arith.constant 0 : i32
    %c0_i32_0 = arith.constant 0 : i32
    %c0_i32_1 = arith.constant 0 : i32
    return %c0_i32, %c0_i32_0 : i32, i32
  }
  func.func @transform_10(%arg0: i32) -> (i32, i32) {
    %c0_i32 = arith.constant 0 : i32
    %c0_i32_0 = arith.constant 0 : i32
    return %arg0, %c0_i32 : i32, i32
  }
}

</mosaic_0001>

<bundles_post_ra>
// kernel: tpu_custom_call.1
= control target key start
LH: loop header
LB: loop body
LE: loop exit
PB: predicated region body
PF: predicated region fallthrough
CT: control target
= control target key end

     0   :  { %s3084_s0 = inlined_call_operand.hbm [shape: bf16[32,32], index: 0, kind: input, shape index: {}]   ;;  %s3085_s1 = inlined_call_operand.hbm [shape: bf16[32,32], index: 1, kind: input, shape index: {}]   ;;  %s3086_s2 = inlined_call_operand.vmem [shape: f32[1,32], index: 2, kind: input, shape index: {}]   ;;  %s3087_s3 = inlined_call_operand.hbm [shape: bf16[32,32], index: 3, kind: input, shape index: {}]   ;;  %s3088_s4 = inlined_call_operand.vmem [shape: f32[1,32], index: 4, kind: input, shape index: {}]   ;;  %s3089_s5 = inlined_call_operand.vmem [shape: bf16[32,32], index: 5, kind: input, shape index: {}]   ;;  %s3090_s6 = inlined_call_operand.vmem [shape: f32[1,32], index: 6, kind: input, shape index: {}]   ;;  %s3091_s7 = inlined_call_operand.hbm [shape: bf16[4,8,8], index: 7, kind: input, shape index: {}]   ;;  %s3092_s8 = inlined_call_operand.hbm [shape: bf16[32,32], index: 8, kind: input, shape index: {}]   ;;  %s3093_s9 = inlined_call_operand.vmem [shape: f32[1,32], index: 9, kind: input, shape index: {}]   ;;  %s3094_s10 = inlined_call_operand.hbm [shape: f32[32,32], index: 10, kind: output, shape index: {}]  }
   0x1   :  { %3101 = sst [smem:[#allocation18_spill]] %s3093_s9 }
   0x2   :  { %3102 = sst [smem:[#allocation19_spill]] %s3094_s10 }
   0x3   :  { %15 = vsyncpa [#allocation3], 0 }
   0x4   :  { %17 = vsyncpa [#allocation3 + $0x1], 0 }
   0x5   :  { %18 = vsyncpa [#allocation6], 0 }
   0x6   :  { %19 = vsyncpa [#allocation9], 0 }
   0x7   :  { %20 = vsyncpa [#allocation4], 0 }
   0x8   :  { %22 = vsyncpa [#allocation4 + $0x1], 0  ;;  %s2563_s13 = smov 0   ;;  %s2565_s14 = smov 0  }
   0x9   :  { %s2567_s15 = smov 0   ;;  %s2569_s16 = smov 0  }
   0xa LB: > { %3103 = sst [smem:[#allocation16_spill]] %s2479_s13  ;;  %s2584_s17 = sadd.s32 4294967295, %s2491_s16   ;;  %s2491_s16 = sphi %s2569_s16, %s3128_s16   ;;  %s2487_s15 = sphi %s2567_s15, %s3127_s15   ;;  %s2483_s14 = sphi %s2565_s14, %s3126_s14   ;;  %s2479_s13 = sphi %s2563_s13, %s3125_s13  }
   0xb   : > { %s1877_s18 = sadd.s32 4294967294, %s2491_s16   ;;  %p48_p0 = scmp.ne.s32.totalorder %s2483_s14, %s2479_s13 }
   0xc   : > { %p3095_p1 = scmp.eq.s32.totalorder %s2584_s17, 0  ;;  %p267_p3 = scmp.eq.s32.totalorder %s1877_s18, 1 }
   0xd   : > { %p1878_p5 = scmp.ge.s32.totalorder %s2491_s16, 1  ;;  %p274_p7 = scmp.lt.s32.totalorder %s2491_s16, 3 }
   0xe   : > { %p2593_p4 = por %p3095_p1, %p48_p0  ;;  %p2598_p6 = por %p267_p3, %p48_p0 }
   0xf   : > { %p2603_p8 = pnand %p1878_p5, %p274_p7  ;;  %s2493_s22 = smov [#allocation5]  }
  0x10   : > { %s3104_s19 = scalar_select %p2593_p4, 1, 0 }
  0x11   : > { %s3105_s20 = scalar_select %p2598_p6, 1, 0 }
  0x12   : > { %s3107_s21 = scalar_select %p2603_p8, 1, 0 }
  0x13   : > { %3106 = sst [smem:[#allocation17_spill]] %s3105_s20  ;;  %s286_s23 = sshll.u32 %s2493_s22, 4  ;;  %s2607_s23 = int_to_ptr.vmem [resolvable:$true] %s286_s23 }
  0x14   : > { %p2160_p9 = pneg %p2603_p8  ;;  %s2494_s25 = smov [#allocation8]  }
  0x15   : > { %s324_s26 = sshll.u32 %s2494_s25, 4  ;;  %s2495_s27 = smov [#allocation7]   ;;  %s2618_s26 = int_to_ptr.vmem [resolvable:$true] %s324_s26 }
  0x16   : > { %p2614_p11 = pnand %p2160_p9, %p3095_p1  ;;  %s2620_s28 = sshll.u32 %s2495_s27, 4  ;;  %s303_s28 = int_to_ptr.vmem [resolvable:$true] %s2620_s28 }
  0x17   : > { %s2275_s11 = scalar_lea.hbm %s3085_s1, 256 }
  0x18   : > { %p2276_p12 = scmp.ne.s32.totalorder %s3085_s1, %s2275_s11  ;;  %p2630_p13 = pneg %p2614_p11 }
  0x19   : > { %p2282_p5 = scmp.lt.u32.totalorder %s2275_s11, %s3085_s1 }
  0x1a   : > { %p2278_p0 = pnand %p2630_p13, %p2276_p12 }
  0x1c   : > { %p2279_p3 = pneg %p2278_p0 }
  0x1e   : > { %p2284_p7 = pnand %p2282_p5, %p2279_p3 }
  0x20   : > { %2287 = shalt.err (!%p2284_p7)
}
  0x21   : > { %s2288_s29 = scalar_lea.vmem %s2607_s23, 256  ;;  %p2296_p2 = scmp.lt.s32.totalorder %s2607_s23, %s2607_s23 }
  0x22   : > { %p2289_p9 = scmp.ne.s32.totalorder %s2607_s23, %s2288_s29  ;;  %p2297_p6 = scmp.lt.s32.totalorder %s2288_s29, %s2288_s29 }
  0x24   : > { %p2291_p10 = pnand %p2289_p9, %p2630_p13  ;;  %p2298_p12 = por %p2297_p6, %p2296_p2 }
  0x26   : > { %p2292_p1 = pneg %p2291_p10 }
  0x28   : > { %p2299_p0 = pnand %p2298_p12, %p2292_p1 }
  0x2a   : > { %2302 = shalt.err (!%p2299_p0)
}
  0x2b   : > { %s2496_s30 = smov 64   ;;  %s2497_s11 = smov 4  }
  0x2c   : > { %2163 = dma.hbm_to_vmem [thread:$0]  (!%p2614_p11), %s3085_s1, 256, %s2607_s23, [#allocation6], %s2496_s30, %s2496_s30, %s2497_s11  }
  0x2d   : > { %s2303_s29 = scalar_lea.hbm %s3091_s7, 256 }
  0x2e   : > { %p2304_p1 = scmp.ne.s32.totalorder %s3091_s7, %s2303_s29  ;;  %p2310_p10 = scmp.lt.u32.totalorder %s2303_s29, %s3091_s7 }
  0x30   : > { %p2306_p2 = pnand %p2304_p1, %p2630_p13 }
  0x32   : > { %p2307_p6 = pneg %p2306_p2 }
  0x34   : > { %p2312_p3 = pnand %p2310_p10, %p2307_p6 }
  0x36   : > { %2315 = shalt.err (!%p2312_p3)
}
  0x37   : > { %s2316_s23 = scalar_lea.vmem %s2618_s26, 256  ;;  %p2324_p12 = scmp.lt.s32.totalorder %s2618_s26, %s2618_s26 }
  0x38   : > { %p2317_p5 = scmp.ne.s32.totalorder %s2618_s26, %s2316_s23  ;;  %p2325_p0 = scmp.lt.s32.totalorder %s2316_s23, %s2316_s23 }
  0x3a   : > { %p2319_p7 = pnand %p2317_p5, %p2630_p13  ;;  %p2326_p1 = por %p2325_p0, %p2324_p12 }
  0x3c   : > { %p2320_p9 = pneg %p2319_p7 }
  0x3e   : > { %p2327_p2 = pnand %p2326_p1, %p2320_p9 }
  0x40   : > { %2330 = shalt.err (!%p2327_p2)
}
  0x41   : > { %2169 = dma.hbm_to_vmem [thread:$0]  (!%p2614_p11), %s3091_s7, 256, %s2618_s26, [#allocation9], %s2496_s30, %s2496_s30, %s2497_s11  }
  0x42   : > { %s2331_s12 = scalar_lea.hbm %s3087_s3, 256 }
  0x43   : > { %p2332_p6 = scmp.ne.s32.totalorder %s3087_s3, %s2331_s12  ;;  %p2338_p5 = scmp.lt.u32.totalorder %s2331_s12, %s3087_s3 }
  0x45   : > { %p2334_p10 = pnand %p2332_p6, %p2630_p13 }
  0x47   : > { %p2335_p3 = pneg %p2334_p10 }
  0x49   : > { %p2340_p7 = pnand %p2338_p5, %p2335_p3 }
  0x4b   : > { %2343 = shalt.err (!%p2340_p7)
}
  0x4c   : > { %s2344_s23 = scalar_lea.vmem %s303_s28, 256  ;;  %p2352_p1 = scmp.lt.s32.totalorder %s303_s28, %s303_s28 }
  0x4d   : > { %p2345_p9 = scmp.ne.s32.totalorder %s303_s28, %s2344_s23  ;;  %p2353_p2 = scmp.lt.s32.totalorder %s2344_s23, %s2344_s23 }
  0x4f   : > { %p2347_p12 = pnand %p2345_p9, %p2630_p13  ;;  %p2354_p4 = por %p2353_p2, %p2352_p1 }
  0x51   : > { %p2348_p0 = pneg %p2347_p12 }
  0x53   : > { %p2355_p8 = pnand %p2354_p4, %p2348_p0 }
  0x55   : > { %2358 = shalt.err (!%p2355_p8)
}
  0x56   : > { %2166 = dma.hbm_to_vmem [thread:$0]  (!%p2614_p11), %s3087_s3, 256, %s303_s28, [#allocation6], %s2496_s30, %s2496_s30, %s2497_s11  }
  0x57   : > { %s2498_s10 = smov [#allocation10]   ;;  %s2359_s18 = scalar_lea.hbm %s3092_s8, 256 }
  0x58   : > { %s337_s13 = sshll.u32 %s2498_s10, 4  ;;  %p2360_p4 = scmp.ne.s32.totalorder %s3092_s8, %s2359_s18  ;;  %s338_s13 = int_to_ptr.vmem [resolvable:$true] %s337_s13 }
  0x59   : > { %p2366_p10 = scmp.lt.u32.totalorder %s2359_s18, %s3092_s8 }
  0x5a   : > { %p2362_p8 = pnand %p2360_p4, %p2630_p13 }
  0x5c   : > { %p2363_p6 = pneg %p2362_p8 }
  0x5e   : > { %p2368_p3 = pnand %p2366_p10, %p2363_p6 }
  0x60   : > { %2371 = shalt.err (!%p2368_p3)
}
  0x61   : > { %s2372_s28 = scalar_lea.vmem %s338_s13, 256  ;;  %p2380_p12 = scmp.lt.s32.totalorder %s338_s13, %s338_s13 }
  0x62   : > { %p2373_p5 = scmp.ne.s32.totalorder %s338_s13, %s2372_s28  ;;  %p2381_p0 = scmp.lt.s32.totalorder %s2372_s28, %s2372_s28 }
  0x64   : > { %p2375_p7 = pnand %p2373_p5, %p2630_p13  ;;  %p2382_p1 = por %p2381_p0, %p2380_p12 }
  0x66   : > { %p2376_p9 = pneg %p2375_p7 }
  0x68   : > { %p2383_p2 = pnand %p2382_p1, %p2376_p9 }
  0x6a   : > { %2386 = shalt.err (!%p2383_p2)
}
  0x6b   : > { %2172 = dma.hbm_to_vmem [thread:$0]  (!%p2614_p11), %s3092_s8, 256, %s338_s13, [#allocation9], %s2496_s30, %s2496_s30, %s2497_s11  }
  0x6c   : > { %s2724_s22 = sadd.s32 1, %s2491_s16   ;;  %s35_s24 = sadd.s32 1, %s2487_s15 }
  0x6d   : > { %s32_s10 = ssub.s32 %s2491_s16, %s2724_s22  ;;  %p42_p13 = scmp.ne.s32.totalorder %s2487_s15, %s2483_s14 }
  0x6e   : > { %p33_p4 = scmp.eq.s32.totalorder %s32_s10, 0  ;;  %p43_p8 = scmp.eq.s32.totalorder %s2491_s16, 0 }
  0x6f   : > { %p3110_p6 = scmp.eq.s32.totalorder %s2584_s17, 1  ;;  %p2185_p3 = scmp.lt.s32.totalorder %s2491_s16, 2 }
  0x70   : > { %s2740_s12 = scalar_select %p33_p4, %s2487_s15, %s35_s24  }
  0x71   : > { %p2734_p10 = por %p3110_p6, %p42_p13  ;;  %p44_p5 = por %p43_p8, %p42_p13 }
  0x72   : > { %s354_s18 = sand.u32 1, %s2487_s15   ;;  %s1939_s13 = sshll.u32 %s2491_s16, 7 }
  0x73   : > { %s1884_s25 = sshll.u32 %s354_s18, 3  ;;  %s2747_s23 = scalar_lea.hbm %s3084_s0, %s1939_s13 }
  0x74   : > { %s358_s28 = scalar_lea.vmem [#allocation2], %s1884_s25  ;;  %p2751_p11 = pnand %p2185_p3, %p44_p5 }
  0x75   : > { %s365_s26 = sshll.u32 %s358_s28, 4  ;;  %s2755_s24 = scalar_lea.sflag [#allocation3], %s354_s18  ;;  %s2749_s26 = int_to_ptr.vmem [resolvable:$true] %s365_s26 }
  0x76   : > { %s2387_s10 = scalar_lea.hbm %s2747_s23, 128  ;;  %p2389_p9 = pneg %p2751_p11 }
  0x77   : > { %p2388_p7 = scmp.ne.s32.totalorder %s2747_s23, %s2387_s10  ;;  %s2392_s27 = scalar_lea.hbm %s3084_s0, 256 }
  0x78   : > { %p2393_p1 = scmp.lt.u32.totalorder %s2747_s23, %s3084_s0  ;;  %p2394_p2 = scmp.lt.u32.totalorder %s2392_s27, %s2387_s10 }
  0x79   : > { %p2390_p12 = pnand %p2389_p9, %p2388_p7  ;;  %p2396_p4 = scmp.lt.u32.totalorder %s2387_s10, %s2747_s23 }
  0x7a   : > { %p2395_p13 = por %p2394_p2, %p2393_p1 }
  0x7b   : > { %p2391_p0 = pneg %p2390_p12 }
  0x7c   : > { %p2397_p8 = por %p2396_p4, %p2395_p13 }
  0x7e   : > { %p2398_p6 = pnand %p2397_p8, %p2391_p0 }
  0x80   : > { %2401 = shalt.err (!%p2398_p6)
}
  0x81   : > { %s2402_s18 = scalar_lea.vmem %s2749_s26, 128  ;;  %s2499_s25 = smov [#allocation2]  }
  0x82   : > { %p2403_p3 = scmp.ne.s32.totalorder %s2749_s26, %s2402_s18  ;;  %s2407_s13 = sshll.u32 %s2499_s25, 4  ;;  %s2408_s13 = int_to_ptr.vmem [resolvable:$false] %s2407_s13 }
  0x83   : > { %s2409_s29 = scalar_lea.vmem %s2408_s13, 256  ;;  %p2410_p12 = scmp.lt.s32.totalorder %s2749_s26, %s2408_s13 }
  0x84   : > { %p2405_p5 = pnand %p2403_p3, %p2389_p9  ;;  %p2411_p1 = scmp.lt.s32.totalorder %s2409_s29, %s2402_s18 }
  0x86   : > { %p2406_p7 = pneg %p2405_p5  ;;  %p2412_p2 = por %p2411_p1, %p2410_p12 }
  0x88   : > { %p2413_p13 = pnand %p2412_p2, %p2406_p7 }
  0x8a   : > { %2416 = shalt.err (!%p2413_p13)
}
  0x8b   : > { %2176 = dma.hbm_to_vmem [thread:$0]  (!%p2751_p11), %s2747_s23, 128, %s2749_s26, %s2755_s24, %s2496_s30, %s2496_s30, %s2497_s11  }
  0x8c   : > { %p3113_p9 = scmp.ne.s32.totalorder %s3107_s21, 0 }
  0x8d   : > { %s2789_s10 = sand.u32 (!%p3113_p9), 1, %s2483_s14   ;;  %p3114_p0 = scmp.ne.s32.totalorder (!%p3113_p9), %s3104_s19, 0 }
  0x8e   : > { %377 = sbr.rel (%p3113_p9) target bundleno = 3413 (0xd55), region = 60  ;;  %s1888_s27 = sshll.u32 (!%p3113_p9), %s2789_s10, 3 }
  0x8f   : > { %s380_s28 = scalar_lea.sflag (!%p3113_p9), [#allocation3], %s2789_s10  ;;  %s383_s18 = scalar_lea.vmem (!%p3113_p9), [#allocation2], %s1888_s27 }
  0x95   : > { %2462 = dma.done.wait (%p3114_p0), %s380_s28, 128  }
  0x96   : > { %2464 = vsyncadd (%p3114_p0), %s380_s28, 4294967168  ;;  %p3115_p4 = scmp.eq.s32.totalorder %s2584_s17, 0 }
  0x98   : > { %2466 = dma.done.wait (%p3115_p4), [#allocation6], 512   ;;  %p3116_p11 = pmov %p3115_p4 }
  0x99   : > { %p3117_p8 = pmov %p3115_p4 }
  0x9a   : > { %2468 = vsyncadd (%p3116_p11), [#allocation6], 4294966784 }
  0x9b   : > { %2470 = dma.done.wait (%p3117_p8), [#allocation9], 512   ;;  %p3118_p6 = pmov %p3115_p4 }
  0x9c   : > { %v2500_v0 = vmov 0.0   ;;  %vm2501_vm0 = vmmov 0   ;;  %v2236_v1 = vld [vmem:[#allocation7] sm:$0xff]   ;;  %v2237_v2 = vld [vmem:[#allocation7 + $0x8] sm:$0xff]   ;;  %v2238_v3 = vld [vmem:[#allocation5] sm:$0xff]   ;;  %vm469_vm1 = vcmask 261120  }
  0x9d   : > { %2472 = vsyncadd (%p3118_p6), [#allocation9], 4294966784  ;;  %2004 = vmatprep.subr.bf16.mxu1 %v2500_v0  ;;  %1996 = vmatprep.subr.bf16.mxu0 %v2500_v0  ;;  %v2240_v4 = vld [vmem:[#allocation5 + $0x8] sm:$0xff]   ;;  %v2239_v5 = vld [vmem:[%s383_s18] sm:$0xff]   ;;  %vm662_vm2 = vcmask 64512   ;;  %s2502_s25 = smov 120  }
  0x9e   : > { %2008 = vmatprep.mubr.msk.bf16.mxu1 %vm2501_vm0, %v2500_v0  ;;  %2000 = vmatprep.mubr.msk.bf16.mxu0 %vm2501_vm0, %v2500_v0  ;;  %v2241_v6 = vld [vmem:[%s3089_s5] sm:$0xff]   ;;  %v2242_v7 = vld [vmem:[%s3089_s5 + $0x8] sm:$0xff]   ;;  %vm782_vm3 = vcmask 1043456   ;;  %v2875_v39 = vld [vmem:[#allocation8] sm:$0xff]   ;;  %s2503_s27 = smov 112   ;;  %s2504_s28 = smov 104  }
  0x9f   : > { %2005 = vmatpush3.bf16.msra.mxu1 %v2236_v1  ;;  %1997 = vmatpush3.bf16.msra.mxu0 %v2238_v3  ;;  %v1899_v8 = vld [vmem:[%s3088_s4] ss:$0 sm:$0xff]  ;;  %v661_v40 = vunpack.c.l.bf16 %v2875_v39  ;;  %s1893_s18 = sshll.u32 %s2789_s10, 4  ;;  %s3119_s30 = sld [smem:[#allocation18_spill]] }
  0xa0   : > { %2006 = vmatprep.subr.bf16.mxu1 %v2500_v0  ;;  %1998 = vmatprep.subr.bf16.mxu0 %v2500_v0  ;;  %v1894_v13 = vld [vmem:[%s3086_s2] ss:$0 sm:$0xff]  ;;  %s1946_s11 = sshll.u32 %s2584_s17, 8  ;;  %s435_s23 = scalar_lea.vmem [#allocation11], %s1893_s18 }
  0xa1   : > { %v1903_v32 = vld [vmem:[%s3090_s6] ss:$0 sm:$0xff]  ;;  %s1766_s26 = sshll.u32 %s435_s23, 4  ;;  %s1753_s17 = scalar_lea.sflag [#allocation4], %s2789_s10  ;;  %s3038_s26 = int_to_ptr.vmem [resolvable:$true] %s1766_s26 }
  0xa2   : > { %s2417_s29 = scalar_lea.vmem %s3038_s26, 256 }
  0xa3   : > { %2007 = vmatpush3.bf16.msra.mxu1 %v2237_v2  ;;  %1999 = vmatpush3.bf16.msra.mxu0 %v2240_v4  ;;  %p2418_p3 = scmp.ne.s32.totalorder %s3038_s26, %s2417_s29 }
  0xa4   : > { %2020 = vmatprep.subr.bf16.mxu1 %v2500_v0  ;;  %2012 = vmatprep.subr.bf16.mxu0 %v2500_v0 }
  0xa5   : > { %p2419_p5 = pnand %p2418_p3, %p2734_p10 }
  0xa6   : > { %2009 = vmatmul.mubr.msk.bf16.vlgmr.msra.gmra.mrb[0].mxu1 %vm469_vm1, %v2239_v5  ;;  %2001 = vmatmul.mubr.msk.bf16.vlgmr.msra.gmra.mrb[0].mxu0 %vm469_vm1, %v2239_v5 }
  0xa7   : > { %2022 = vmatprep.mubr.msk.bf16.mxu1 %vm2501_vm0, %v2500_v0  ;;  %2013 = vmatpush3.bf16.msra.mxu0 %v2241_v6  ;;  %p2420_p7 = pneg %p2419_p5 }
  0xa8   : > { %2016 = vmatprep.mubr.msk.bf16.mxu0 %vm2501_vm0, %v2500_v0  ;;  %2014 = vmatprep.subr.bf16.mxu0 %v2500_v0 }
  0xab   : > { %2015 = vmatpush3.bf16.msra.mxu0 %v2242_v7 }
  0xac   : > { %2026 = vmatprep.subr.bf16.mxu0 %v2500_v0 }
  0xae   : > { %2017 = vmatmul.mubr.msk.bf16.vlgmr.msra.gmra.mrb[4].mxu0 %vm469_vm1, %v2239_v5 }
  0xaf   : > { %2028 = vmatprep.mubr.msk.bf16.mxu0 %vm2501_vm0, %v2500_v0 }
 0x179   : > { %v571_v9 = vpop.f32.mrb[0].mxu1  ;;  %v507_v14 = vpop.f32.mrb[0].mxu0 }
 0x17a   : > { %v572_v10 = vadd.f32 %v1899_v8, %v571_v9  ;;  %v2010_v11 = vpop.f32.mrb[1].mxu1  ;;  %v2002_v18 = vpop.f32.mrb[1].mxu0  ;;  %v508_v21 = vadd.f32 %v1894_v13, %v507_v14 }
 0x17b   : > { %v574_v12 = vpop.f32.mrb[2].mxu1  ;;  %v510_v19 = vpop.f32.mrb[2].mxu0 }
 0x17c   : > { %v2838_v15 = vpack.c.bf16 %v572_v10, %v572_v10  ;;  %v575_v16 = vadd.f32 %v1899_v8, %v574_v12  ;;  %v2011_v17 = vpop.f32.mrb[3].mxu1  ;;  %v2003_v23 = vpop.f32.mrb[3].mxu0  ;;  %v2849_v25 = vpack.c.bf16 %v508_v21, %v508_v21  ;;  %v511_v26 = vadd.f32 %v1894_v13, %v510_v19 }
 0x17d   : > { %v876_v23 = vunpack.c.h.bf16 %v2875_v39 }
 0x17e   : > { %v2840_v20 = vpack.c.bf16 %v575_v16, %v575_v16  ;;  %v667_v22 = vsel %vm662_vm2, %v2838_v15, 0  ;;  %v2852_v30 = vpack.c.bf16 %v511_v26, %v511_v26 }
 0x17f   : > { %2021 = vmatpush3.bf16.xpose.msra.mxu1 %v667_v22 }
 0x180   : > { %929 = vrot.lane.b32.xlu1 %v2840_v20, %s2502_s25  ;;  %v713_v24 = vsel %vm662_vm2, %v2840_v20, 0  ;;  %2032 = vmatprep.subr.bf16.mxu1 %v2500_v0 }
 0x181   : > { %2027 = vmatpush3.bf16.xpose.msra.mxu0 %v713_v24  ;;  %v635_v27 = vpop.f32.mrb[4].mxu0 }
 0x182   : > { %2038 = vmatprep.subr.bf16.mxu0 %v2500_v0  ;;  %v2018_v28 = vpop.f32.mrb[5].mxu0  ;;  %v636_v33 = vadd.f32 %v1903_v32, %v635_v27 }
 0x183   : > { %v638_v29 = vpop.f32.mrb[6].mxu0 }
 0x184   : > { %v2019_v31 = vpop.f32.mrb[7].mxu0  ;;  %v639_v34 = vadd.f32 %v1903_v32, %v638_v29  ;;  %v2865_v35 = vpack.c.bf16 %v636_v33, %v636_v33 }
 0x186   : > { %2023 = vmatmul.mubr.msk.bf16.vlgmr.msra.gmra.mrb[4].mxu1 %vm662_vm2, %v2849_v25  ;;  %v2867_v36 = vpack.c.bf16 %v639_v34, %v639_v34  ;;  %v784_v37 = vsel %vm782_vm3, %v2865_v35, 0 }
 0x187   : > { %2034 = vmatprep.mubr.msk.bf16.mxu1 %vm2501_vm0, %v2500_v0  ;;  %2033 = vmatpush3.bf16.msra.mxu1 %v784_v37 }
 0x188   : > { %2029 = vmatmul.mubr.msk.bf16.vlgmr.msra.gmra.mrb[8].mxu0 %vm662_vm2, %v2852_v30  ;;  %v830_v38 = vsel %vm782_vm3, %v2867_v36, 0  ;;  %2044 = vmatprep.subr.bf16.mxu1 %v2500_v0 }
 0x189   : > { %2040 = vmatprep.mubr.msk.bf16.mxu0 %vm2501_vm0, %v2500_v0  ;;  %2039 = vmatpush3.bf16.msra.mxu0 %v830_v38 }
 0x18a   : > { %2050 = vmatprep.subr.bf16.mxu0 %v2500_v0 }
 0x1f2   : > { %v930_v63 = vpop.permute.xlu1 %929 }
 0x1f3   : > { %v935_v11 = vsel %vm662_vm2, %v930_v63, 0 }
 0x259   : > { %v703_v41 = vpop.f32.mrb[4].mxu1 }
 0x25a   : > { %v704_v42 = vadd.f32 %v703_v41, %v661_v40  ;;  %v2024_v43 = vpop.f32.mrb[5].mxu1 }
 0x25b   : > { %v706_v44 = vpop.f32.mrb[6].mxu1  ;;  %v749_v45 = vpop.f32.mrb[8].mxu0 }
 0x25c   : > { %v750_v46 = vadd.f32 %v749_v45, %v661_v40  ;;  %v2025_v47 = vpop.f32.mrb[7].mxu1  ;;  %v2030_v48 = vpop.f32.mrb[9].mxu0  ;;  %v755_v49 = vsel %vm662_vm2, %v704_v42, -inf }
 0x25d   : > { %756 = vmax.xlane.f32.xlu0 %v755_v49  ;;  %v752_v50 = vpop.f32.mrb[10].mxu0 }
 0x25e   : > { %v2031_v51 = vpop.f32.mrb[11].mxu0  ;;  %v758_v52 = vsel %vm662_vm2, %v750_v46, -inf }
 0x261   : > { %759 = vmax.xlane.f32.xlu0 %v758_v52 }
 0x277   : > { %879 = vrot.lane.b32.xlu0 %v2838_v15, %s2502_s25 }
 0x2ea   : > { %v757_v53 = vpop.xlane.xlu0 %756 }
 0x2eb   : > { %v761_v54 = vsub.f32 %v704_v42, %v757_v53 }
 0x2ed   : > { %v763_v55 = vmul.f32 1.442695, %v761_v54 }
 0x2ee   : > { %v760_v56 = vpop.xlane.xlu0 %759 }
 0x2ef   : > { %2243 = vpow2.f32 %v763_v55  ;;  %v762_v57 = vsub.f32 %v750_v46, %v760_v56 }
 0x2f1   : > { %v765_v58 = vmul.f32 1.442695, %v762_v57 }
 0x2f2   : > { %v880_v5 = vpop.permute.xlu0 %879 }
 0x2f3   : > { %2245 = vpow2.f32 %v765_v58  ;;  %v885_v8 = vsel %vm662_vm2, %v880_v5, 0 }
 0x2f9   : > { %v2244_v59 = vpop.eup %2243 }
 0x2fa   : > { %v767_v60 = vsel %vm662_vm2, %v2244_v59, 0.0 }
 0x2fb   : > { %768 = vadd.xlane.f32.xlu1 %v767_v60 }
 0x2fd   : > { %v2246_v61 = vpop.eup %2245 }
 0x2fe   : > { %v770_v62 = vsel %vm662_vm2, %v2246_v61, 0.0 }
 0x2ff   : > { %771 = vadd.xlane.f32.xlu1 %v770_v62 }
 0x310   : > { %877 = vrot.lane.b32.xlu1 %v2849_v25, %s2502_s25 }
 0x314   : > { %927 = vrot.lane.b32.xlu1 %v2852_v30, %s2502_s25 }
 0x388   : > { %v769_v1 = vpop.xlane.xlu1 %768 }
 0x389   : > { %2247 = vrcp.f32 %v769_v1  ;;  %v873_v1 = vld [vmem:[#allocation10] sm:$0xf] }
 0x38c   : > { %v772_v2 = vpop.xlane.xlu1 %771 }
 0x38d   : > { %2249 = vrcp.f32 %v772_v2 }
 0x390   : > { %v878_v12 = vpop.permute.xlu1 %877 }
 0x393   : > { %v2248_v3 = vpop.eup %2247 }
 0x394   : > { %v775_v4 = vmul.f32 %v2248_v3, %v2244_v59  ;;  %v928_v13 = vpop.permute.xlu1 %927  ;;  %v1098_v59 = vld [vmem:[#allocation10 + $0x4] sm:$0xf] }
 0x395   : > { %v1103_v62 = vsel %vm782_vm3, %v1098_v59, 0 }
 0x396   : > { %v777_v6 = vpack.c.bf16 %v775_v4, %v775_v4  ;;  %v1150_v4 = vsel %vm782_vm3, %v873_v1, 0 }
 0x397   : > { %v2250_v7 = vpop.eup %2249 }
 0x398   : > { %v776_v9 = vmul.f32 %v2250_v7, %v2246_v61  ;;  %2035 = vmatmul.mubr.msk.bf16.vlgmr.msra.gmra.mrb[8].mxu1 %vm662_vm2, %v777_v6 }
 0x399   : > { %2045 = vmatpush3.bf16.xpose.msra.mxu1 %v885_v8  ;;  %2046 = vmatprep.mubr.msk.bf16.mxu1 %vm2501_vm0, %v2500_v0 }
 0x39a   : > { %v778_v10 = vpack.c.bf16 %v776_v9, %v776_v9  ;;  %2056 = vmatprep.subr.bf16.mxu1 %v2500_v0 }
 0x39c   : > { %2041 = vmatmul.mubr.msk.bf16.vlgmr.msra.gmra.mrb[12].mxu0 %vm662_vm2, %v778_v10 }
 0x39d   : > { %2051 = vmatpush3.bf16.xpose.msra.mxu0 %v935_v11  ;;  %2052 = vmatprep.mubr.msk.bf16.mxu0 %vm2501_vm0, %v2500_v0 }
 0x39e   : > { %2062 = vmatprep.subr.bf16.mxu0 %v2500_v0 }
 0x3a0   : > { %2047 = vmatmul.mubr.msk.bf16.vlgmr.msra.gmra.mrb[12].mxu1 %vm662_vm2, %v878_v12 }
 0x3a1   : > { %2058 = vmatprep.mubr.msk.bf16.mxu1 %vm2501_vm0, %v2500_v0 }
 0x3a4   : > { %2053 = vmatmul.mubr.msk.bf16.vlgmr.msra.gmra.mrb[16].mxu0 %vm662_vm2, %v928_v13 }
 0x3a5   : > { %2064 = vmatprep.mubr.msk.bf16.mxu0 %vm2501_vm0, %v2500_v0 }
 0x46b   : > { %v2904_v14 = vpop.f32.mrb[8].mxu1 }
 0x46c   : > { %v2036_v16 = vpop.f32.mrb[9].mxu1 }
 0x46d   : > { %v823_v17 = vpop.f32.mrb[10].mxu1 }
 0x46e   : > { %v2037_v18 = vpop.f32.mrb[11].mxu1 }
 0x46f   : > { %v2906_v19 = vpop.f32.mrb[12].mxu0 }
 0x470   : > { %v872_v21 = vpack.c.bf16 %v2906_v19, %v2904_v14  ;;  %v2042_v22 = vpop.f32.mrb[13].mxu0 }
 0x471   : > { %v869_v24 = vpop.f32.mrb[14].mxu0 }
 0x472   : > { %v2043_v26 = vpop.f32.mrb[15].mxu0 }
 0x473   : > { %v921_v27 = vpop.f32.mrb[12].mxu1 }
 0x474   : > { %v922_v28 = vadd.f32 %v921_v27, %v876_v23  ;;  %v2048_v29 = vpop.f32.mrb[13].mxu1  ;;  %v2958_v27 = vld [vmem:[#allocation8 + $0x8] sm:$0xff]  }
 0x475   : > { %v924_v31 = vpop.f32.mrb[14].mxu1 }
 0x476   : > { %v2049_v32 = vpop.f32.mrb[15].mxu1  ;;  %v977_v33 = vsel %vm662_vm2, %v922_v28, -inf }
 0x477   : > { %978 = vmax.xlane.f32.xlu0 %v977_v33  ;;  %v971_v34 = vpop.f32.mrb[16].mxu0 }
 0x478   : > { %v972_v37 = vadd.f32 %v971_v34, %v876_v23  ;;  %v2054_v38 = vpop.f32.mrb[17].mxu0 }
 0x479   : > { %v974_v40 = vpop.f32.mrb[18].mxu0 }
 0x47a   : > { %v2055_v41 = vpop.f32.mrb[19].mxu0  ;;  %v980_v42 = vsel %vm662_vm2, %v972_v37, -inf }
 0x47b   : > { %981 = vmax.xlane.f32.xlu1 %v980_v42 }
 0x48c   : > { %1049 = vrot.lane.b32.xlu1 %v2867_v36, %s2502_s25 }
 0x490   : > { %1198 = vrot.lane.b32.xlu1 %v2838_v15, %s2503_s27 }
 0x494   : > { %1248 = vrot.lane.b32.xlu1 %v2840_v20, %s2503_s27 }
 0x498   : > { %1246 = vrot.lane.b32.xlu1 %v2852_v30, %s2503_s27 }
 0x504   : > { %v979_v39 = vpop.xlane.xlu0 %978 }
 0x505   : > { %v983_v43 = vsub.f32 %v922_v28, %v979_v39  ;;  %v1195_v28 = vunpack.c.l.bf16 %v2958_v27 }
 0x507   : > { %v985_v44 = vmul.f32 1.442695, %v983_v43 }
 0x508   : > { %v982_v45 = vpop.xlane.xlu1 %981 }
 0x509   : > { %2251 = vpow2.f32 %v985_v44  ;;  %v984_v46 = vsub.f32 %v972_v37, %v982_v45 }
 0x50b   : > { %v987_v47 = vmul.f32 1.442695, %v984_v46 }
 0x50c   : > { %v1050_v48 = vpop.permute.xlu1 %1049 }
 0x50d   : > { %2253 = vpow2.f32 %v987_v47  ;;  %v1055_v49 = vsel %vm782_vm3, %v1050_v48, 0 }
 0x50e   : > { %2063 = vmatpush3.bf16.msra.mxu0 %v1055_v49 }
 0x50f   : > { %2074 = vmatprep.subr.bf16.mxu0 %v2500_v0 }
 0x510   : > { %v1199_v5 = vpop.permute.xlu1 %1198 }
 0x511   : > { %v1204_v18 = vsel %vm662_vm2, %v1199_v5, 0 }
 0x513   : > { %v2252_v50 = vpop.eup %2251 }
 0x514   : > { %v989_v51 = vsel %vm662_vm2, %v2252_v50, 0.0  ;;  %v1249_v6 = vpop.permute.xlu1 %1248 }
 0x515   : > { %990 = vadd.xlane.f32.xlu0 %v989_v51  ;;  %v1254_v7 = vsel %vm662_vm2, %v1249_v6, 0 }
 0x517   : > { %v2254_v52 = vpop.eup %2253 }
 0x518   : > { %v992_v53 = vsel %vm662_vm2, %v2254_v52, 0.0  ;;  %v1247_v8 = vpop.permute.xlu1 %1246 }
 0x519   : > { %993 = vadd.xlane.f32.xlu0 %v992_v53 }
 0x52f   : > { %1001 = vrot.lane.b32.xlu0 %v2865_v35, %s2502_s25  ;;  %s3120_s25 = sld [smem:[#allocation19_spill]] }
 0x533   : > { %1196 = vrot.lane.b32.xlu0 %v2849_v25, %s2503_s27 }
 0x535   : > { %s3036_s13 = scalar_lea.hbm %s3120_s25, %s1946_s11 }
 0x5a2   : > { %v991_v54 = vpop.xlane.xlu0 %990 }
 0x5a3   : > { %2255 = vrcp.f32 %v991_v54 }
 0x5a6   : > { %v994_v55 = vpop.xlane.xlu0 %993 }
 0x5a7   : > { %2257 = vrcp.f32 %v994_v55 }
 0x5aa   : > { %v1002_v56 = vpop.permute.xlu0 %1001 }
 0x5ab   : > { %v1007_v57 = vsel %vm782_vm3, %v1002_v56, 0 }
 0x5ac   : > { %2057 = vmatpush3.bf16.msra.mxu1 %v1007_v57 }
 0x5ad   : > { %v2256_v58 = vpop.eup %2255  ;;  %2068 = vmatprep.subr.bf16.mxu1 %v2500_v0 }
 0x5ae   : > { %v997_v60 = vmul.f32 %v2256_v58, %v2252_v50  ;;  %v1197_v23 = vpop.permute.xlu0 %1196 }
 0x5b0   : > { %v999_v61 = vpack.c.bf16 %v997_v60, %v997_v60 }
 0x5b1   : > { %v2258_v63 = vpop.eup %2257 }
 0x5b2   : > { %v998_v2 = vmul.f32 %v2258_v63, %v2254_v52  ;;  %2059 = vmatmul.mubr.msk.bf16.vlgmr.msra.gmra.mrb[16].mxu1 %vm662_vm2, %v999_v61 }
 0x5b3   : > { %2069 = vmatpush3.bf16.msra.mxu1 %v1103_v62  ;;  %2070 = vmatprep.mubr.msk.bf16.mxu1 %vm2501_vm0, %v2500_v0 }
 0x5b4   : > { %v1000_v3 = vpack.c.bf16 %v998_v2, %v998_v2  ;;  %2080 = vmatprep.subr.bf16.mxu1 %v2500_v0 }
 0x5b6   : > { %2065 = vmatmul.mubr.msk.bf16.vlgmr.msra.gmra.mrb[20].mxu0 %vm662_vm2, %v1000_v3 }
 0x5b7   : > { %2075 = vmatpush3.bf16.msra.mxu0 %v1150_v4  ;;  %2076 = vmatprep.mubr.msk.bf16.mxu0 %vm2501_vm0, %v2500_v0 }
 0x5b8   : > { %2086 = vmatprep.subr.bf16.mxu0 %v2500_v0 }
 0x5be   : > { %2077 = vmatmul.mubr.msk.bf16.vlgmr.msra.gmra.mrb[24].mxu0 %vm662_vm2, %v872_v21 }
 0x5bf   : > { %2088 = vmatprep.mubr.msk.bf16.mxu0 %vm2501_vm0, %v2500_v0 }
 0x5c0   : > { %2087 = vmatpush3.bf16.xpose.msra.mxu0 %v1254_v7 }
 0x5c1   : > { %2098 = vmatprep.subr.bf16.mxu0 %v2500_v0 }
 0x5c7   : > { %2089 = vmatmul.mubr.msk.bf16.vlgmr.msra.gmra.mrb[28].mxu0 %vm662_vm2, %v1247_v8 }
 0x5c8   : > { %2100 = vmatprep.mubr.msk.bf16.mxu0 %vm2501_vm0, %v2500_v0 }
 0x685   : > { %v1043_v9 = vpop.f32.mrb[16].mxu1 }
 0x686   : > { %v2060_v10 = vpop.f32.mrb[17].mxu1 }
 0x687   : > { %v1046_v11 = vpop.f32.mrb[18].mxu1 }
 0x688   : > { %v2061_v12 = vpop.f32.mrb[19].mxu1 }
 0x689   : > { %v1091_v13 = vpop.f32.mrb[20].mxu0  ;;  %v1417_v12 = vld [vmem:[#allocation10 + $0x8] sm:$0xf] }
 0x68a   : > { %v1097_v14 = vpack.c.bf16 %v1091_v13, %v1043_v9  ;;  %v2066_v16 = vpop.f32.mrb[21].mxu0  ;;  %v1422_v13 = vsel %vm782_vm3, %v1417_v12, 0 }
 0x68b   : > { %v1094_v17 = vpop.f32.mrb[22].mxu0 }
 0x68c   : > { %v2067_v19 = vpop.f32.mrb[23].mxu0  ;;  %2071 = vmatmul.mubr.msk.bf16.vlgmr.msra.gmra.mrb[20].mxu1 %vm662_vm2, %v1097_v14  ;;  %v1469_v14 = vunpack.c.h.bf16 %v2958_v27 }
 0x68d   : > { %2081 = vmatpush3.bf16.xpose.msra.mxu1 %v1204_v18  ;;  %2082 = vmatprep.mubr.msk.bf16.mxu1 %vm2501_vm0, %v2500_v0 }
 0x68e   : > { %2092 = vmatprep.subr.bf16.mxu1 %v2500_v0 }
 0x691   : > { %v1186_v21 = vpop.f32.mrb[24].mxu0 }
 0x692   : > { %v2078_v22 = vpop.f32.mrb[25].mxu0 }
 0x693   : > { %v1189_v24 = vpop.f32.mrb[26].mxu0 }
 0x694   : > { %v2079_v26 = vpop.f32.mrb[27].mxu0  ;;  %2083 = vmatmul.mubr.msk.bf16.vlgmr.msra.gmra.mrb[24].mxu1 %vm662_vm2, %v1197_v23 }
 0x695   : > { %2094 = vmatprep.mubr.msk.bf16.mxu1 %vm2501_vm0, %v2500_v0 }
 0x69a   : > { %v1290_v29 = vpop.f32.mrb[28].mxu0 }
 0x69b   : > { %v1291_v31 = vadd.f32 %v1290_v29, %v1195_v28  ;;  %v2090_v32 = vpop.f32.mrb[29].mxu0 }
 0x69c   : > { %v1293_v33 = vpop.f32.mrb[30].mxu0 }
 0x69d   : > { %v2091_v34 = vpop.f32.mrb[31].mxu0  ;;  %v1299_v37 = vsel %vm662_vm2, %v1291_v31, -inf }
 0x69e   : > { %1300 = vmax.xlane.f32.xlu1 %v1299_v37 }
 0x6af   : > { %1368 = vrot.lane.b32.xlu1 %v2867_v36, %s2503_s27 }
 0x6b3   : > { %1472 = vrot.lane.b32.xlu1 %v2838_v15, %s2504_s28 }
 0x6b7   : > { %1522 = vrot.lane.b32.xlu1 %v2840_v20, %s2504_s28 }
 0x6bb   : > { %1520 = vrot.lane.b32.xlu1 %v2852_v30, %s2504_s28 }
 0x72b   : > { %v1301_v38 = vpop.xlane.xlu1 %1300 }
 0x72c   : > { %v1303_v42 = vsub.f32 %v1291_v31, %v1301_v38 }
 0x72e   : > { %v1306_v39 = vmul.f32 1.442695, %v1303_v42 }
 0x72f   : > { %v1369_v40 = vpop.permute.xlu1 %1368 }
 0x730   : > { %v1374_v41 = vsel %vm782_vm3, %v1369_v40, 0  ;;  %2259 = vpow2.f32 %v1306_v39 }
 0x731   : > { %2099 = vmatpush3.bf16.msra.mxu0 %v1374_v41 }
 0x732   : > { %2110 = vmatprep.subr.bf16.mxu0 %v2500_v0 }
 0x733   : > { %v1473_v62 = vpop.permute.xlu1 %1472 }
 0x734   : > { %v1478_v1 = vsel %vm662_vm2, %v1473_v62, 0 }
 0x737   : > { %v1523_v23 = vpop.permute.xlu1 %1522 }
 0x738   : > { %v1528_v31 = vsel %vm662_vm2, %v1523_v23, 0 }
 0x73a   : > { %v2260_v52 = vpop.eup %2259 }
 0x73b   : > { %v1311_v53 = vsel %vm662_vm2, %v2260_v52, 0.0  ;;  %v1521_v27 = vpop.permute.xlu1 %1520 }
 0x75f   : > { %v1139_v43 = vpop.f32.mrb[20].mxu1 }
 0x760   : > { %v2974_v44 = vadd.f32 %v1186_v21, %v1139_v43  ;;  %v2072_v45 = vpop.f32.mrb[21].mxu1 }
 0x761   : > { %v1142_v15 = vpop.f32.mrb[22].mxu1 }
 0x762   : > { %v2976_v46 = vadd.f32 %v1189_v24, %v1142_v15  ;;  %v2073_v20 = vpop.f32.mrb[23].mxu1 }
 0x767   : > { %v1240_v47 = vpop.f32.mrb[24].mxu1 }
 0x768   : > { %v1241_v30 = vadd.f32 %v1240_v47, %v1195_v28  ;;  %v2084_v48 = vpop.f32.mrb[25].mxu1 }
 0x769   : > { %v1243_v49 = vpop.f32.mrb[26].mxu1 }
 0x76a   : > { %v2085_v50 = vpop.f32.mrb[27].mxu1  ;;  %v1296_v51 = vsel %vm662_vm2, %v1241_v30, -inf }
 0x76b   : > { %1297 = vmax.xlane.f32.xlu0 %v1296_v51 }
 0x76f   : > { %1312 = vadd.xlane.f32.xlu0 %v1311_v53 }
 0x7f8   : > { %v1298_v54 = vpop.xlane.xlu0 %1297 }
 0x7f9   : > { %v1302_v55 = vsub.f32 %v1241_v30, %v1298_v54 }
 0x7fb   : > { %v1304_v56 = vmul.f32 1.442695, %v1302_v55 }
 0x7fc   : > { %v1313_v57 = vpop.xlane.xlu0 %1312 }
 0x7fd   : > { %2261 = vpow2.f32 %v1304_v56 }
 0x7fe   : > { %2263 = vrcp.f32 %v1313_v57 }
 0x807   : > { %v2262_v58 = vpop.eup %2261 }
 0x808   : > { %v2264_v59 = vpop.eup %2263  ;;  %v1308_v60 = vsel %vm662_vm2, %v2262_v58, 0.0 }
 0x809   : > { %v1317_v61 = vmul.f32 %v2264_v59, %v2260_v52  ;;  %1309 = vadd.xlane.f32.xlu0 %v1308_v60 }
 0x80b   : > { %v1319_v63 = vpack.c.bf16 %v1317_v61, %v1317_v61 }
 0x80d   : > { %2101 = vmatmul.mubr.msk.bf16.vlgmr.msra.gmra.mrb[32].mxu0 %vm662_vm2, %v1319_v63 }
 0x80e   : > { %2111 = vmatpush3.bf16.xpose.msra.mxu0 %v1478_v1  ;;  %2112 = vmatprep.mubr.msk.bf16.mxu0 %vm2501_vm0, %v2500_v0  ;;  %v1691_v1 = vld [vmem:[#allocation10 + $0xc] sm:$0xf] }
 0x80f   : > { %2122 = vmatprep.subr.bf16.mxu0 %v2500_v0 }
 0x81f   : > { %1320 = vrot.lane.b32.xlu0 %v2865_v35, %s2503_s27  ;;  %s2505_s27 = smov [#allocation11]  }
 0x823   : > { %1470 = vrot.lane.b32.xlu0 %v2849_v25, %s2504_s28 }
 0x896   : > { %v1310_v2 = vpop.xlane.xlu0 %1309 }
 0x897   : > { %2265 = vrcp.f32 %v1310_v2  ;;  %v1696_v2 = vsel %vm782_vm3, %v1691_v1, 0 }
 0x89a   : > { %v1321_v3 = vpop.permute.xlu0 %1320 }
 0x89b   : > { %v1326_v4 = vsel %vm782_vm3, %v1321_v3, 0 }
 0x89c   : > { %2093 = vmatpush3.bf16.msra.mxu1 %v1326_v4 }
 0x89d   : > { %2104 = vmatprep.subr.bf16.mxu1 %v2500_v0 }
 0x89e   : > { %v1471_v5 = vpop.permute.xlu0 %1470 }
 0x89f   : > { %2113 = vmatmul.mubr.msk.bf16.vlgmr.msra.gmra.mrb[36].mxu0 %vm662_vm2, %v1471_v5 }
 0x8a0   : > { %2124 = vmatprep.mubr.msk.bf16.mxu0 %vm2501_vm0, %v2500_v0 }
 0x8a1   : > { %v2266_v6 = vpop.eup %2265 }
 0x8a2   : > { %v1316_v7 = vmul.f32 %v2266_v6, %v2262_v58 }
 0x8a4   : > { %v1318_v8 = vpack.c.bf16 %v1316_v7, %v1316_v7 }
 0x8a6   : > { %2095 = vmatmul.mubr.msk.bf16.vlgmr.msra.gmra.mrb[28].mxu1 %vm662_vm2, %v1318_v8 }
 0x8a7   : > { %2106 = vmatprep.mubr.msk.bf16.mxu1 %vm2501_vm0, %v2500_v0  ;;  %2105 = vmatpush3.bf16.msra.mxu1 %v1422_v13 }
 0x8a8   : > { %2116 = vmatprep.subr.bf16.mxu1 %v2500_v0 }
 0x8e0   : > { %v1410_v25 = vpop.f32.mrb[32].mxu0 }
 0x8e1   : > { %v2102_v9 = vpop.f32.mrb[33].mxu0 }
 0x8e2   : > { %v1413_v10 = vpop.f32.mrb[34].mxu0 }
 0x8e3   : > { %v2103_v11 = vpop.f32.mrb[35].mxu0 }
 0x8e4   : > { %v1933_v11 = vld [vmem:[%s3119_s30] ss:$0 sm:$0xff] }
 0x972   : > { %v1514_v16 = vpop.f32.mrb[36].mxu0 }
 0x973   : > { %v1515_v17 = vadd.f32 %v1514_v16, %v1469_v14  ;;  %v2114_v18 = vpop.f32.mrb[37].mxu0 }
 0x974   : > { %v1517_v19 = vpop.f32.mrb[38].mxu0 }
 0x975   : > { %v2115_v21 = vpop.f32.mrb[39].mxu0  ;;  %v1570_v22 = vsel %vm662_vm2, %v1515_v17, -inf }
 0x976   : > { %1571 = vmax.xlane.f32.xlu0 %v1570_v22 }
 0x979   : > { %v1362_v24 = vpop.f32.mrb[28].mxu1 }
 0x97a   : > { %v1416_v26 = vpack.c.bf16 %v1410_v25, %v1362_v24  ;;  %v2096_v28 = vpop.f32.mrb[29].mxu1 }
 0x97b   : > { %v1365_v29 = vpop.f32.mrb[30].mxu1 }
 0x97c   : > { %v2097_v32 = vpop.f32.mrb[31].mxu1  ;;  %2107 = vmatmul.mubr.msk.bf16.vlgmr.msra.gmra.mrb[32].mxu1 %vm662_vm2, %v1416_v26 }
 0x97d   : > { %2117 = vmatpush3.bf16.xpose.msra.mxu1 %v1528_v31  ;;  %2118 = vmatprep.mubr.msk.bf16.mxu1 %vm2501_vm0, %v2500_v0 }
 0x97e   : > { %2128 = vmatprep.subr.bf16.mxu1 %v2500_v0 }
 0x984   : > { %2119 = vmatmul.mubr.msk.bf16.vlgmr.msra.gmra.mrb[36].mxu1 %vm662_vm2, %v1521_v27 }
 0x985   : > { %2130 = vmatprep.mubr.msk.bf16.mxu1 %vm2501_vm0, %v2500_v0 }
 0xa03   : > { %v1572_v33 = vpop.xlane.xlu0 %1571 }
 0xa04   : > { %v1576_v34 = vsub.f32 %v1515_v17, %v1572_v33 }
 0xa06   : > { %v1578_v37 = vmul.f32 1.442695, %v1576_v34 }
 0xa08   : > { %2267 = vpow2.f32 %v1578_v37 }
 0xa12   : > { %v2268_v38 = vpop.eup %2267 }
 0xa13   : > { %v1582_v40 = vsel %vm662_vm2, %v2268_v38, 0.0 }
 0xa14   : > { %1583 = vadd.xlane.f32.xlu0 %v1582_v40 }
 0xa4f   : > { %v1458_v41 = vpop.f32.mrb[32].mxu1 }
 0xa50   : > { %v1465_v42 = vadd.f32 %v1458_v41, %v2974_v44  ;;  %v2108_v39 = vpop.f32.mrb[33].mxu1 }
 0xa51   : > { %v1461_v43 = vpop.f32.mrb[34].mxu1 }
 0xa52   : > { %v1466_v45 = vadd.f32 %v1461_v43, %v2976_v46  ;;  %v2109_v15 = vpop.f32.mrb[35].mxu1 }
 0xa57   : > { %v1564_v20 = vpop.f32.mrb[36].mxu1 }
 0xa58   : > { %v1565_v47 = vadd.f32 %v1564_v20, %v1469_v14  ;;  %v2120_v30 = vpop.f32.mrb[37].mxu1 }
 0xa59   : > { %v1567_v48 = vpop.f32.mrb[38].mxu1 }
 0xa5a   : > { %v2121_v49 = vpop.f32.mrb[39].mxu1  ;;  %v1573_v50 = vsel %vm662_vm2, %v1565_v47, -inf }
 0xa5b   : > { %1574 = vmax.xlane.f32.xlu1 %v1573_v50 }
 0xa6c   : > { %1642 = vrot.lane.b32.xlu1 %v2867_v36, %s2504_s28 }
 0xaa1   : > { %v1584_v56 = vpop.xlane.xlu0 %1583 }
 0xae8   : > { %v1575_v51 = vpop.xlane.xlu1 %1574 }
 0xae9   : > { %v1577_v52 = vsub.f32 %v1565_v47, %v1575_v51 }
 0xaeb   : > { %v1580_v53 = vmul.f32 1.442695, %v1577_v52 }
 0xaec   : > { %v1643_v44 = vpop.permute.xlu1 %1642 }
 0xaed   : > { %2269 = vpow2.f32 %v1580_v53  ;;  %v1648_v54 = vsel %vm782_vm3, %v1643_v44, 0 }
 0xaee   : > { %2129 = vmatpush3.bf16.msra.mxu1 %v1648_v54  ;;  %2271 = vrcp.f32 %v1584_v56 }
 0xaf7   : > { %v2270_v46 = vpop.eup %2269 }
 0xaf8   : > { %v1585_v55 = vsel %vm662_vm2, %v2270_v46, 0.0  ;;  %v2272_v57 = vpop.eup %2271 }
 0xaf9   : > { %1586 = vadd.xlane.f32.xlu0 %v1585_v55  ;;  %v1590_v36 = vmul.f32 %v2272_v57, %v2268_v38 }
 0xafb   : > { %v1592_v61 = vpack.c.bf16 %v1590_v36, %v1590_v36 }
 0xb0f   : > { %1594 = vrot.lane.b32.xlu0 %v2865_v35, %s2504_s28  ;;  %s2421_s28 = sshll.u32 %s2505_s27, 4  ;;  %s2422_s28 = int_to_ptr.vmem [resolvable:$false] %s2421_s28 }
 0xb10   : > { %s2423_s18 = scalar_lea.vmem %s2422_s28, 512  ;;  %p2424_p12 = scmp.lt.s32.totalorder %s3038_s26, %s2422_s28 }
 0xb11   : > { %p2425_p1 = scmp.lt.s32.totalorder %s2423_s18, %s2417_s29 }
 0xb13   : > { %p2426_p2 = por %p2425_p1, %p2424_p12 }
 0xb15   : > { %p2427_p13 = pnand %p2426_p2, %p2420_p7 }
 0xb86   : > { %v1587_v58 = vpop.xlane.xlu0 %1586 }
 0xb87   : > { %2273 = vrcp.f32 %v1587_v58 }
 0xb8a   : > { %v1595_v59 = vpop.permute.xlu0 %1594 }
 0xb8b   : > { %v1600_v60 = vsel %vm782_vm3, %v1595_v59, 0 }
 0xb8c   : > { %2123 = vmatpush3.bf16.msra.mxu0 %v1600_v60 }
 0xb8d   : > { %2134 = vmatprep.subr.bf16.mxu0 %v2500_v0 }
 0xb8f   : > { %2125 = vmatmul.mubr.msk.bf16.vlgmr.msra.gmra.mrb[40].mxu0 %vm662_vm2, %v1592_v61 }
 0xb90   : > { %2136 = vmatprep.mubr.msk.bf16.mxu0 %vm2501_vm0, %v2500_v0  ;;  %2135 = vmatpush3.bf16.msra.mxu0 %v1696_v2 }
 0xb91   : > { %v2274_v62 = vpop.eup %2273 }
 0xb92   : > { %v1591_v35 = vmul.f32 %v2274_v62, %v2270_v46 }
 0xb94   : > { %v1593_v63 = vpack.c.bf16 %v1591_v35, %v1591_v35 }
 0xb96   : > { %2131 = vmatmul.mubr.msk.bf16.vlgmr.msra.gmra.mrb[40].mxu1 %vm662_vm2, %v1593_v63 }
 0xc62   : > { %v1636_v3 = vpop.f32.mrb[40].mxu0 }
 0xc63   : > { %v2126_v4 = vpop.f32.mrb[41].mxu0 }
 0xc64   : > { %v1639_v5 = vpop.f32.mrb[42].mxu0 }
 0xc65   : > { %v2127_v6 = vpop.f32.mrb[43].mxu0 }
 0xc69   : > { %v1684_v7 = vpop.f32.mrb[40].mxu1 }
 0xc6a   : > { %v1690_v8 = vpack.c.bf16 %v1684_v7, %v1636_v3  ;;  %v2132_v25 = vpop.f32.mrb[41].mxu1 }
 0xc6b   : > { %v1687_v9 = vpop.f32.mrb[42].mxu1 }
 0xc6c   : > { %v2133_v0 = vpop.f32.mrb[43].mxu1  ;;  %2137 = vmatmul.mubr.msk.bf16.vlgmr.msra.gmra.mrb[44].mxu0 %vm662_vm2, %v1690_v8 }
 0xd3f   : > { %v1732_v10 = vpop.f32.mrb[44].mxu0 }
 0xd40   : > { %v1739_v12 = vadd.f32 %v1732_v10, %v1465_v42  ;;  %v2138_v13 = vpop.f32.mrb[45].mxu0 }
 0xd41   : > { %v1735_v14 = vpop.f32.mrb[46].mxu0 }
 0xd42   : > { %v1748_v16 = vadd.f32 %v1933_v11, %v1739_v12  ;;  %v1740_v17 = vadd.f32 %v1735_v14, %v1466_v45  ;;  %v2139_v18 = vpop.f32.mrb[47].mxu0 }
 0xd44   : > { %1750 = vst.msk [vmem:[%s435_s23] sm:$0xff] %vm469_vm1, %v1748_v16  ;;  %v1749_v19 = vadd.f32 %v1933_v11, %v1740_v17 }
 0xd46   : > { %1751 = vst.msk [vmem:[%s435_s23 + $0x8] sm:$0xff] %vm469_vm1, %v1749_v19 }
 0xd47   : > { %2430 = shalt.err (!%p2427_p13)
}
 0xd48   : > { %s2431_s19 = scalar_lea.hbm %s3036_s13, 256  ;;  %s2435_s11 = scalar_lea.hbm %s3120_s25, 512 }
 0xd49   : > { %p2432_p9 = scmp.ne.s32.totalorder %s3036_s13, %s2431_s19  ;;  %p2436_p11 = scmp.lt.u32.totalorder %s3036_s13, %s3120_s25 }
 0xd4a   : > { %p2437_p8 = scmp.lt.u32.totalorder %s2435_s11, %s2431_s19  ;;  %p2439_p3 = scmp.lt.u32.totalorder %s2431_s19, %s3036_s13 }
 0xd4b   : > { %p2433_p0 = pnand %p2432_p9, %p2734_p10 }
 0xd4c   : > { %p2438_p6 = por %p2437_p8, %p2436_p11 }
 0xd4d   : > { %p2434_p4 = pneg %p2433_p0 }
 0xd4e   : > { %p2440_p5 = por %p2439_p3, %p2438_p6 }
 0xd50   : > { %p2441_p7 = pnand %p2440_p5, %p2434_p4 }
 0xd52   : > { %2444 = shalt.err (!%p2441_p7)
}
 0xd53   : > { %s2506_s24 = smov 128   ;;  %s2507_s29 = smov 8  }
 0xd54   : > { %2158 = dma.vmem_to_hbm [thread:$0]  (%p2734_p10), %s3038_s26, 256, %s3036_s13, %s1753_s17, %s2506_s24, %s2506_s24, %s2507_s29  }
 0xd55 PF: > { %s3121_s27 = sld [smem:[#allocation16_spill]]  ;;  %s3122_s28 = sld [smem:[#allocation17_spill]] }
 0xd56   : > { %p3124_p1 = scmp.ge.s32.totalorder %s2491_s16, 2 }
 0xd5b   : > { %s1781_s18 = sand.u32 1, %s3121_s27   ;;  %p3123_p12 = scmp.ne.s32.totalorder %s3122_s28, 0 }
 0xd5c   : > { %s1782_s19 = scalar_lea.sflag [#allocation4], %s1781_s18 }
 0xd5d   : > { %p2178_p2 = pnand %p3124_p1, %p3123_p12 }
 0xd5f   : > { %2474 = dma.done.wait (!%p2178_p2), %s1782_s19, 256  }
 0xd60   : > { %2476 = vsyncadd (!%p2178_p2), %s1782_s19, 4294967040  ;;  %p25_p13 = scmp.ge.s32.totalorder %s2724_s22, 4   ;;  %s3125_s13 = smov %s2483_s14 }
 0xd61   : > { %s3126_s14 = smov %s2487_s15  ;;  %s3127_s15 = smov %s2740_s12 }
 0xd62   : > { %s3128_s16 = smov %s2724_s22  ;;  %27 = sbr.rel (!%p25_p13) target bundleno = 10 (0xa), region = 124 }
 0xd69   :  { %1787 = vsyncpa [#allocation3], 1 }
 0xd6a   :  { %1789 = vsyncpa [#allocation3 + $0x1], 1 }
 0xd6b   :  { %1790 = vsyncpa [#allocation6], 1 }
 0xd6c   :  { %1791 = vsyncpa [#allocation9], 1 }
 0xd6d   :  { %1792 = vsyncpa [#allocation4], 1 }
 0xd6e   :  { %1794 = vsyncpa [#allocation4 + $0x1], 1 }

</bundles_post_ra>
